<compile_context>
chip_gen: v6e
topology: v6e:2x2x1
jax: 0.10.0
libtpu: 0.0.40
codegen_flags: <defaults>
</compile_context>

<pallas_src>
import jax
import jax.numpy as jnp
from jax.experimental import pallas as pl
from jax.experimental.pallas import tpu as pltpu

OUT_FEATURES = 2      # real output width of layer_2
OUT_LANES = 128       # MXU-friendly padded width of w2 / y
OUT_STORE = 8         # narrow width actually written back to HBM


def mlp_kernel(x_ref, w1_ref, b1_ref, w2_ref, b2_ref, o_ref):
    # x tile:(TB,1024) f32, w1:(1024,256) bf16, b1:(1,256) f32,
    # w2:(256,128) bf16 (cols 2..127 zero), b2:(1,128) f32, o:(TB,8) f32.
    x = x_ref[...].astype(jnp.bfloat16)                               # VPU cast, hidden under DMA
    h = jnp.dot(x, w1_ref[...], preferred_element_type=jnp.float32)   # MXU, f32 acc
    h = jnp.maximum(h + b1_ref[...], 0.0)                             # f32 bias + ReLU (VPU)
    # Dropout(0.5): identity (eval mode)
    y = jnp.dot(h.astype(jnp.bfloat16), w2_ref[...],
                preferred_element_type=jnp.float32)                   # (TB, 128)
    o_ref[...] = (y + b2_ref[...])[:, :OUT_STORE].astype(o_ref.dtype)  # narrow store


def _round_up(n, m):
    return ((n + m - 1) // m) * m


def _vmem_budget_bytes(tb, k, hidden):
    """Explicit scoped-VMEM request (v5e default is only 16 MiB)."""
    x_bytes = 2 * tb * k * 4                     # double-buffered f32 x tiles
    out_bytes = 2 * tb * OUT_STORE * 4           # double-buffered output tiles
    w_bytes = 2 * (k * hidden * 2 + hidden * 4 + hidden * OUT_LANES * 2 + OUT_LANES * 4)
    inter = tb * k * 2 + tb * hidden * 4 + tb * OUT_LANES * 4   # bf16 x, f32 h, f32 y
    # Margin, capped safely below v7x's 64 MiB physical VMEM.
    return int(min(56 << 20, x_bytes + out_bytes + w_bytes + inter + (4 << 20)))


def prepare_params(w1, b1, w2, b2):
    """Cast matmul operands to bf16 and lane-pad the 2-wide output to 128."""
    hidden, n_out = w2.shape
    w2p = jnp.zeros((hidden, OUT_LANES), jnp.float32).at[:, :n_out].set(w2)
    b2p = jnp.zeros((1, OUT_LANES), jnp.float32).at[:, :n_out].set(b2.reshape(1, -1))
    return (w1.astype(jnp.bfloat16),
            b1.reshape(1, -1).astype(jnp.float32),
            w2p.astype(jnp.bfloat16),
            b2p.astype(jnp.float32))


def mlp_forward(x, w1_bf16, b1, w2p_bf16, b2p, *, tb=2048):
    """x: (B, 1024) float32 (passed untouched to the kernel). Returns (B, 2) f32."""
    B, K = x.shape
    hidden = w1_bf16.shape[1]

    # Clamp the batch tile for small B; keep it a multiple of 8 (sublane).
    tb = min(tb, _round_up(B, 8))
    assert tb % 8 == 0
    grid = (pl.cdiv(B, tb),)     # ragged tail handled by Pallas partial block

    flops = 2 * B * K * hidden + 2 * B * hidden * OUT_LANES
    bytes_accessed = (B * K * 4                       # x read (f32)
                      + K * hidden * 2 + hidden * 4   # w1, b1 (read once)
                      + hidden * OUT_LANES * 2 + OUT_LANES * 4
                      + B * OUT_STORE * 4)            # narrow output write

    out = pl.pallas_call(
        mlp_kernel,
        out_shape=jax.ShapeDtypeStruct((B, OUT_STORE), jnp.float32),
        grid=grid,
        in_specs=[
            pl.BlockSpec((tb, K), lambda i: (i, 0)),              # x tile (pipelined)
            pl.BlockSpec((K, hidden), lambda i: (0, 0)),          # w1 resident
            pl.BlockSpec((1, hidden), lambda i: (0, 0)),          # b1 resident
            pl.BlockSpec((hidden, OUT_LANES), lambda i: (0, 0)),  # w2 (padded) resident
            pl.BlockSpec((1, OUT_LANES), lambda i: (0, 0)),       # b2 (padded) resident
        ],
        out_specs=pl.BlockSpec((tb, OUT_STORE), lambda i: (i, 0)),
        compiler_params=pltpu.CompilerParams(
            dimension_semantics=("parallel",),                 # both TCs on v7x
            vmem_limit_bytes=_vmem_budget_bytes(tb, K, hidden)),
        cost_estimate=pl.CostEstimate(flops=flops, transcendentals=0,
                                      bytes_accessed=bytes_accessed),
    )(x, w1_bf16, b1, w2p_bf16, b2p)

    return out[:, :OUT_FEATURES]


def init_params(key, input_size=32 * 32, hidden=256, out=OUT_FEATURES):
    """Deterministic PyTorch-style (uniform +/- 1/sqrt(fan_in)) init, f32."""
    k1, k2, k3, k4 = jax.random.split(key, 4)
    bound1 = 1.0 / (input_size ** 0.5)
    bound2 = 1.0 / (hidden ** 0.5)
    # Stored as (in, out): already "transposed" relative to nn.Linear's (out, in).
    w1 = jax.random.uniform(k1, (input_size, hidden), jnp.float32, -bound1, bound1)
    b1 = jax.random.uniform(k2, (hidden,), jnp.float32, -bound1, bound1)
    w2 = jax.random.uniform(k3, (hidden, out), jnp.float32, -bound2, bound2)
    b2 = jax.random.uniform(k4, (out,), jnp.float32, -bound2, bound2)
    return w1, b1, w2, b2


if __name__ == "__main__":
    key = jax.random.PRNGKey(0)
    kx, kp = jax.random.split(key)

    # Small demo shape (multi-step grid: B=256, TB=128 -> 2 pipelined steps,
    # one per TensorCore on v7x). Production callers should leave tb=2048.
    B, INPUT = 256, 32 * 32
    x = jax.random.normal(kx, (B, INPUT), jnp.float32)
    w1, b1, w2, b2 = init_params(kp, input_size=INPUT)
    w1_bf16, b1_p, w2p_bf16, b2p = prepare_params(w1, b1, w2, b2)

    out = mlp_forward(x, w1_bf16, b1_p, w2p_bf16, b2p, tb=128)
    out = jax.block_until_ready(out)

    # Reference in plain f32 JAX (eval-mode dropout = identity). The kernel
    # uses bf16 MXU operands with f32 accumulation, so tolerance is loosened.
    ref = jnp.maximum(x @ w1 + b1[None, :], 0.0) @ w2 + b2[None, :]
    assert out.shape == (B, OUT_FEATURES)
    assert jnp.allclose(out, ref, atol=5e-2, rtol=5e-2), (
        float(jnp.max(jnp.abs(out - ref))))

    print("KERNEL_OK")
</pallas_src>

<mosaic_0001>
module attributes {stable_mosaic.version = 11 : i64} {
  func.func @mlp_kernel(%arg0: i32, %arg1: memref<128x1024xf32, #tpu.memory_space<vmem>>, %arg2: memref<1024x256xbf16, #tpu.memory_space<vmem>>, %arg3: memref<1x256xf32, #tpu.memory_space<vmem>>, %arg4: memref<256x128xbf16, #tpu.memory_space<vmem>>, %arg5: memref<1x128xf32, #tpu.memory_space<vmem>>, %arg6: memref<128x8xf32, #tpu.memory_space<vmem>>) attributes {dimension_semantics = [#tpu.dimension_semantics<parallel>], iteration_bounds = array<i64: 2>, scalar_prefetch = 0 : i64, scratch_operands = 0 : i64, tpu.core_type = #tpu.core_type<tc>, window_params = [{transform_indices = @transform_0, window_bounds = array<i64: 128, 1024>}, {pipeline_mode = #tpu.pipeline_mode<synchronous>, transform_indices = @transform_1, window_bounds = array<i64: 1024, 256>}, {pipeline_mode = #tpu.pipeline_mode<synchronous>, transform_indices = @transform_2, window_bounds = array<i64: 1, 256>}, {pipeline_mode = #tpu.pipeline_mode<synchronous>, transform_indices = @transform_3, window_bounds = array<i64: 256, 128>}, {pipeline_mode = #tpu.pipeline_mode<synchronous>, transform_indices = @transform_4, window_bounds = array<i64: 1, 128>}, {transform_indices = @transform_5, window_bounds = array<i64: 128, 8>}]} {
    %c0 = arith.constant 0 : index
    %c0_0 = arith.constant 0 : index
    %0 = vector.load %arg1[%c0, %c0_0] : memref<128x1024xf32, #tpu.memory_space<vmem>>, vector<128x1024xf32>
    %1 = arith.truncf %0 : vector<128x1024xf32> to vector<128x1024xbf16>
    %c0_1 = arith.constant 0 : index
    %c0_2 = arith.constant 0 : index
    %2 = vector.load %arg2[%c0_1, %c0_2] : memref<1024x256xbf16, #tpu.memory_space<vmem>>, vector<1024x256xbf16>
    %cst = arith.constant dense<0.000000e+00> : vector<128x256xf32>
    %3 = tpu.matmul %1, %2, %cst {dimension_numbers = #tpu.dot_dimension_numbers<[1], [0], [0], [1], [0, 0, 1, 1], [], []>} : vector<128x1024xbf16>, vector<1024x256xbf16>, vector<128x256xf32> -> vector<128x256xf32>
    %c0_3 = arith.constant 0 : index
    %c0_4 = arith.constant 0 : index
    %4 = vector.load %arg3[%c0_3, %c0_4] : memref<1x256xf32, #tpu.memory_space<vmem>>, vector<1x256xf32>
    %5 = vector.broadcast %4 : vector<1x256xf32> to vector<128x256xf32>
    %6 = arith.addf %3, %5 : vector<128x256xf32>
    %cst_5 = arith.constant 0.000000e+00 : f32
    %7 = vector.broadcast %cst_5 : f32 to vector<128x256xf32>
    %8 = arith.maximumf %6, %7 : vector<128x256xf32>
    %9 = arith.truncf %8 : vector<128x256xf32> to vector<128x256xbf16>
    %c0_6 = arith.constant 0 : index
    %c0_7 = arith.constant 0 : index
    %10 = vector.load %arg4[%c0_6, %c0_7] : memref<256x128xbf16, #tpu.memory_space<vmem>>, vector<256x128xbf16>
    %cst_8 = arith.constant dense<0.000000e+00> : vector<128x128xf32>
    %11 = tpu.matmul %9, %10, %cst_8 {dimension_numbers = #tpu.dot_dimension_numbers<[1], [0], [0], [1], [0, 0, 1, 1], [], []>} : vector<128x256xbf16>, vector<256x128xbf16>, vector<128x128xf32> -> vector<128x128xf32>
    %c0_9 = arith.constant 0 : index
    %c0_10 = arith.constant 0 : index
    %12 = vector.load %arg5[%c0_9, %c0_10] : memref<1x128xf32, #tpu.memory_space<vmem>>, vector<1x128xf32>
    %13 = vector.broadcast %12 : vector<1x128xf32> to vector<128x128xf32>
    %14 = arith.addf %11, %13 : vector<128x128xf32>
    %15 = vector.extract_strided_slice %14 {offsets = [0, 0], sizes = [128, 8], strides = [1, 1]} : vector<128x128xf32> to vector<128x8xf32>
    %c0_11 = arith.constant 0 : index
    %c0_12 = arith.constant 0 : index
    %16 = vector.load %arg6[%c0_11, %c0_12] : memref<128x8xf32, #tpu.memory_space<vmem>>, vector<128x8xf32>
    tpu.vector_store %arg6[%c0_11, %c0_12], %15 {strides = array<i32>} : memref<128x8xf32, #tpu.memory_space<vmem>>, vector<128x8xf32>,
    return
  }
  func.func @transform_0(%arg0: i32) -> (i32, i32) {
    %c0_i32 = arith.constant 0 : i32
    %c0_i32_0 = arith.constant 0 : i32
    return %arg0, %c0_i32 : i32, i32
  }
  func.func @transform_1(%arg0: i32) -> (i32, i32) {
    %c0_i32 = arith.constant 0 : i32
    %c0_i32_0 = arith.constant 0 : i32
    %c0_i32_1 = arith.constant 0 : i32
    return %c0_i32, %c0_i32_0 : i32, i32
  }
  func.func @transform_2(%arg0: i32) -> (i32, i32) {
    %c0_i32 = arith.constant 0 : i32
    %c0_i32_0 = arith.constant 0 : i32
    %c0_i32_1 = arith.constant 0 : i32
    return %c0_i32, %c0_i32_0 : i32, i32
  }
  func.func @transform_3(%arg0: i32) -> (i32, i32) {
    %c0_i32 = arith.constant 0 : i32
    %c0_i32_0 = arith.constant 0 : i32
    %c0_i32_1 = arith.constant 0 : i32
    return %c0_i32, %c0_i32_0 : i32, i32
  }
  func.func @transform_4(%arg0: i32) -> (i32, i32) {
    %c0_i32 = arith.constant 0 : i32
    %c0_i32_0 = arith.constant 0 : i32
    %c0_i32_1 = arith.constant 0 : i32
    return %c0_i32, %c0_i32_0 : i32, i32
  }
  func.func @transform_5(%arg0: i32) -> (i32, i32) {
    %c0_i32 = arith.constant 0 : i32
    %c0_i32_0 = arith.constant 0 : i32
    return %arg0, %c0_i32 : i32, i32
  }
}

</mosaic_0001>

<bundles_post_ra>
// kernel: tpu_custom_call.1
= control target key start
LH: loop header
LB: loop body
LE: loop exit
PB: predicated region body
PF: predicated region fallthrough
CT: control target
= control target key end

     0   :  { %10 = vsyncpa [#allocation3], 0  ;;  %s3272_s0 = inlined_call_operand.hbm [shape: f32[256,1024], index: 0, kind: input, shape index: {}]   ;;  %s3273_s1 = inlined_call_operand.hbm [shape: bf16[1024,256], index: 1, kind: input, shape index: {}]   ;;  %s3274_s2 = inlined_call_operand.vmem [shape: f32[1,256], index: 2, kind: input, shape index: {}]   ;;  %s3275_s3 = inlined_call_operand.hbm [shape: bf16[256,128], index: 3, kind: input, shape index: {}]   ;;  %s3276_s4 = inlined_call_operand.vmem [shape: f32[1,128], index: 4, kind: input, shape index: {}]   ;;  %s3277_s5 = inlined_call_operand.vmem [shape: f32[256,8], index: 5, kind: output, shape index: {}]  }
   0x1   :  { %12 = vsyncpa [#allocation3 + $0x1], 0 }
   0x2   :  { %13 = vsyncpa [#allocation5], 0  ;;  %s2761_s18 = smov 0   ;;  %s2763_s19 = smov 0  }
   0x3   :  { %s2765_s20 = smov 0   ;;  %s2767_s21 = smov 0  }
   0x4 LB: > { %s2085_s22 = sadd.s32 4294967295, %s2721_s21   ;;  %p39_p0 = scmp.ne.s32.totalorder %s2713_s19, %s2709_s18  ;;  %s2721_s21 = sphi %s2767_s21, %s3303_s21   ;;  %s2717_s20 = sphi %s2765_s20, %s3302_s20   ;;  %s2713_s19 = sphi %s2763_s19, %s3301_s19   ;;  %s2709_s18 = sphi %s2761_s18, %s3300_s18  }
   0x5   : > { %p2783_p1 = scmp.eq.s32.totalorder %s2085_s22, 0  ;;  %p2087_p2 = scmp.ge.s32.totalorder %s2721_s21, 1 }
   0x6   : > { %p160_p3 = scmp.lt.s32.totalorder %s2721_s21, 3  ;;  %s2723_s26 = smov [#allocation4]  }
   0x7   : > { %s3282_s23 = scalar_select %p2783_p1, 1, 0 }
   0x8   : > { %p2791_p4 = por %p2783_p1, %p39_p0  ;;  %p2795_p5 = pnand %p2087_p2, %p160_p3 }
   0x9   : > { %s172_s27 = sshll.u32 %s2723_s26, 4  ;;  %s2724_s29 = smov [#allocation6]   ;;  %s173_s27 = int_to_ptr.vmem [resolvable:$true] %s172_s27 }
   0xa   : > { %s3283_s24 = scalar_select %p2791_p4, 1, 0 }
   0xb   : > { %s3284_s25 = scalar_select %p2795_p5, 1, 0 }
   0xc   : > { %p2340_p6 = pneg %p2795_p5  ;;  %s188_s30 = sshll.u32 %s2724_s29, 4  ;;  %s189_s30 = int_to_ptr.vmem [resolvable:$true] %s188_s30 }
   0xd   : > { %s2614_s6 = scalar_lea.vmem %s173_s27, 16384  ;;  %p2622_p12 = scmp.lt.s32.totalorder %s173_s27, %s173_s27 }
   0xe   : > { %p2803_p7 = pnand %p2340_p6, %p2783_p1  ;;  %p2615_p9 = scmp.ne.s32.totalorder %s173_s27, %s2614_s6 }
   0xf   : > { %p2623_p13 = scmp.lt.s32.totalorder %s2614_s6, %s2614_s6 }
  0x10   : > { %p2605_p8 = pneg %p2803_p7 }
  0x11   : > { %p2624_p0 = por %p2623_p13, %p2622_p12 }
  0x12   : > { %p2617_p10 = pnand %p2615_p9, %p2605_p8 }
  0x14   : > { %p2618_p11 = pneg %p2617_p10 }
  0x16   : > { %p2625_p2 = pnand %p2624_p0, %p2618_p11 }
  0x18   : > { %2628 = shalt.err (!%p2625_p2)
}
  0x19   : > { %s2725_s7 = smov 128   ;;  %s2726_s8 = smov 8  }
  0x1a   : > { %2343 = dma.hbm_to_vmem [thread:$0]  (!%p2803_p7), %s3273_s1, 16384, %s173_s27, [#allocation5], %s2725_s7, %s2725_s7, %s2726_s8  }
  0x1b   : > { %s2640_s11 = scalar_lea.vmem %s189_s30, 2048  ;;  %p2648_p10 = scmp.lt.s32.totalorder %s189_s30, %s189_s30 }
  0x1c   : > { %p2641_p3 = scmp.ne.s32.totalorder %s189_s30, %s2640_s11  ;;  %p2649_p1 = scmp.lt.s32.totalorder %s2640_s11, %s2640_s11 }
  0x1e   : > { %p2643_p6 = pnand %p2641_p3, %p2605_p8  ;;  %p2650_p12 = por %p2649_p1, %p2648_p10 }
  0x20   : > { %p2644_p9 = pneg %p2643_p6 }
  0x22   : > { %p2651_p11 = pnand %p2650_p12, %p2644_p9 }
  0x24   : > { %2654 = shalt.err (!%p2651_p11)
}
  0x25   : > { %s2727_s12 = smov 64   ;;  %s2728_s13 = smov 4  }
  0x26   : > { %2346 = dma.hbm_to_vmem [thread:$0]  (!%p2803_p7), %s3275_s3, 2048, %s189_s30, [#allocation5], %s2727_s12, %s2727_s12, %s2728_s13  }
  0x27   : > { %s2828_s16 = sadd.s32 1, %s2721_s21   ;;  %s26_s18 = sadd.s32 1, %s2717_s20 }
  0x28   : > { %s23_s17 = ssub.s32 %s2721_s21, %s2828_s16  ;;  %p33_p8 = scmp.ne.s32.totalorder %s2717_s20, %s2713_s19 }
  0x29   : > { %p24_p1 = scmp.eq.s32.totalorder %s23_s17, 0  ;;  %p34_p13 = scmp.eq.s32.totalorder %s2721_s21, 0 }
  0x2a   : > { %p2353_p2 = scmp.lt.s32.totalorder %s2721_s21, 2  ;;  %s205_s27 = sand.u32 1, %s2717_s20  }
  0x2b   : > { %s2837_s26 = scalar_select %p24_p1, %s2717_s20, %s26_s18  }
  0x2c   : > { %p35_p0 = por %p34_p13, %p33_p8  ;;  %s2249_s28 = sshll.u32 %s2721_s21, 14 }
  0x2d   : > { %s2091_s29 = sshll.u32 %s205_s27, 10  ;;  %s2845_s8 = scalar_lea.hbm %s3272_s0, %s2249_s28 }
  0x2e   : > { %s209_s30 = scalar_lea.vmem [#allocation2], %s2091_s29  ;;  %p2847_p7 = pnand %p2353_p2, %p35_p0 }
  0x2f   : > { %s217_s9 = sshll.u32 %s209_s30, 4  ;;  %s2853_s11 = scalar_lea.sflag [#allocation3], %s205_s27  ;;  %s2851_s9 = int_to_ptr.vmem [resolvable:$true] %s217_s9 }
  0x30   : > { %s2655_s13 = scalar_lea.hbm %s2845_s8, 16384  ;;  %p2657_p6 = pneg %p2847_p7 }
  0x31   : > { %p2656_p3 = scmp.ne.s32.totalorder %s2845_s8, %s2655_s13  ;;  %s2660_s17 = scalar_lea.hbm %s3272_s0, 32768 }
  0x32   : > { %p2661_p12 = scmp.lt.s32.totalorder %s2845_s8, %s3272_s0  ;;  %p2662_p11 = scmp.lt.s32.totalorder %s2660_s17, %s2655_s13 }
  0x33   : > { %p2658_p9 = pnand %p2657_p6, %p2656_p3 }
  0x34   : > { %p2663_p1 = por %p2662_p11, %p2661_p12 }
  0x35   : > { %p2659_p10 = pneg %p2658_p9 }
  0x37   : > { %p2664_p8 = pnand %p2663_p1, %p2659_p10 }
  0x39   : > { %2667 = shalt.err (!%p2664_p8)
}
  0x3a   : > { %s2668_s27 = scalar_lea.vmem %s2851_s9, 16384  ;;  %s2729_s29 = smov [#allocation2]  }
  0x3b   : > { %p2669_p13 = scmp.ne.s32.totalorder %s2851_s9, %s2668_s27  ;;  %s2673_s6 = sshll.u32 %s2729_s29, 4  ;;  %s2674_s6 = int_to_ptr.vmem [resolvable:$false] %s2673_s6 }
  0x3c   : > { %s2675_s7 = scalar_lea.vmem %s2674_s6, 32768  ;;  %p2676_p3 = scmp.lt.s32.totalorder %s2851_s9, %s2674_s6 }
  0x3d   : > { %p2671_p0 = pnand %p2669_p13, %p2657_p6  ;;  %p2677_p9 = scmp.lt.s32.totalorder %s2675_s7, %s2668_s27 }
  0x3f   : > { %p2672_p2 = pneg %p2671_p0  ;;  %p2678_p4 = por %p2677_p9, %p2676_p3 }
  0x41   : > { %p2679_p5 = pnand %p2678_p4, %p2672_p2 }
  0x43   : > { %2682 = shalt.err (!%p2679_p5)
}
  0x44   : > { %s2730_s30 = smov 1024   ;;  %p3287_p6 = scmp.ne.s32.totalorder %s3284_s25, 0 }
  0x45   : > { %2350 = dma.hbm_to_vmem [thread:$0]  (!%p2847_p7), %s2845_s8, 16384, %s2851_s9, %s2853_s11, %s2730_s30, %s2730_s30, %s2727_s12  }
  0x46   : > { %229 = sbr.rel (%p3287_p6) target bundleno = 679 (0x2a7), region = 40 }
  0x4b   : > { %s231_s13 = sand.u32 1, %s2713_s19   ;;  %p3288_p4 = scmp.ne.s32.totalorder %s3283_s24, 0 }
  0x4c   : > { %s2096_s14 = sshll.u32 %s231_s13, 10  ;;  %s232_s15 = scalar_lea.sflag [#allocation3], %s231_s13 }
  0x4d   : > { %s2878_s17 = scalar_lea.vmem [#allocation2], %s2096_s14 }
  0x4e   : > { %2700 = dma.done.wait (%p3288_p4), %s232_s15, 16384  }
  0x4f   : > { %2702 = vsyncadd (%p3288_p4), %s232_s15, 4294950912  ;;  %p3289_p5 = scmp.ne.s32.totalorder %s3282_s23, 0 }
  0x51   : > { %2704 = dma.done.wait (%p3289_p5), [#allocation5], 18432  }
  0x52   : > { %2706 = vsyncadd (%p3289_p5), [#allocation5], 4294948864  ;;  %v2395_v0 = vld [vmem:[#allocation4 + $0x74] ss:$8 sps:$4 sm:$0xff]   ;;  %v2399_v2 = vld [vmem:[#allocation4 + $0x70] ss:$8 sps:$4 sm:$0xff]  }
  0x53   : > { %v2397_v1 = vld [vmem:[#allocation4 + $0x174] ss:$8 sps:$4 sm:$0xff]   ;;  %1250 = vmatprep.subr.bf16.mxu0 %v2395_v0  ;;  %v2400_v3 = vld [vmem:[#allocation4 + $0x170] ss:$8 sps:$4 sm:$0xff]   ;;  %v2401_v4 = vld [vmem:[#allocation4 + $0x64] ss:$8 sps:$4 sm:$0xff]  }
  0x54   : > { %1363 = vmatprep.subr.bf16.mxu1 %v2397_v1  ;;  %1251 = vmatpush1.bf16.msra.mxu0 %v2399_v2  ;;  %v2403_v5 = vld [vmem:[#allocation4 + $0x164] ss:$8 sps:$4 sm:$0xff]   ;;  %v2405_v6 = vld [vmem:[#allocation4 + $0x60] ss:$8 sps:$4 sm:$0xff]   ;;  %v2407_v8 = vld [vmem:[#allocation4 + $0x54] ss:$8 sps:$4 sm:$0xff]  }
  0x55   : > { %1364 = vmatpush1.bf16.msra.mxu1 %v2400_v3  ;;  %1252 = vmatprep.subr.bf16.mxu0 %v2401_v4  ;;  %v2406_v7 = vld [vmem:[#allocation4 + $0x160] ss:$8 sps:$4 sm:$0xff]   ;;  %v2409_v9 = vld [vmem:[#allocation4 + $0x154] ss:$8 sps:$4 sm:$0xff]   ;;  %v2411_v10 = vld [vmem:[#allocation4 + $0x50] ss:$8 sps:$4 sm:$0xff]  }
  0x56   : > { %1365 = vmatprep.subr.bf16.mxu1 %v2403_v5  ;;  %v2412_v11 = vld [vmem:[#allocation4 + $0x150] ss:$8 sps:$4 sm:$0xff]   ;;  %v2413_v12 = vld [vmem:[#allocation4 + $0x44] ss:$8 sps:$4 sm:$0xff]   ;;  %v2417_v14 = vld [vmem:[#allocation4 + $0x40] ss:$8 sps:$4 sm:$0xff]  }
  0x57   : > { %v2415_v13 = vld [vmem:[#allocation4 + $0x144] ss:$8 sps:$4 sm:$0xff]   ;;  %v2418_v15 = vld [vmem:[#allocation4 + $0x140] ss:$8 sps:$4 sm:$0xff]   ;;  %v2419_v16 = vld [vmem:[#allocation4 + $0x34] ss:$8 sps:$4 sm:$0xff]  }
  0x58   : > { %1253 = vmatpush1.bf16.msra.mxu0 %v2405_v6  ;;  %v2421_v17 = vld [vmem:[#allocation4 + $0x134] ss:$8 sps:$4 sm:$0xff]   ;;  %v2423_v18 = vld [vmem:[#allocation4 + $0x30] ss:$8 sps:$4 sm:$0xff]   ;;  %v2425_v20 = vld [vmem:[#allocation4 + $0x24] ss:$8 sps:$4 sm:$0xff]  }
  0x59   : > { %1366 = vmatpush1.bf16.msra.mxu1 %v2406_v7  ;;  %1254 = vmatprep.subr.bf16.mxu0 %v2407_v8  ;;  %v2424_v19 = vld [vmem:[#allocation4 + $0x130] ss:$8 sps:$4 sm:$0xff]   ;;  %v2427_v21 = vld [vmem:[#allocation4 + $0x124] ss:$8 sps:$4 sm:$0xff]   ;;  %v2429_v22 = vld [vmem:[#allocation4 + $0x20] ss:$8 sps:$4 sm:$0xff]  }
  0x5a   : > { %1367 = vmatprep.subr.bf16.mxu1 %v2409_v9  ;;  %v2430_v23 = vld [vmem:[#allocation4 + $0x120] ss:$8 sps:$4 sm:$0xff]   ;;  %v2431_v24 = vld [vmem:[#allocation4 + $0x14] ss:$8 sps:$4 sm:$0xff]   ;;  %v2435_v26 = vld [vmem:[#allocation4 + $0x10] ss:$8 sps:$4 sm:$0xff]  }
  0x5b   : > { %v2433_v25 = vld [vmem:[#allocation4 + $0x114] ss:$8 sps:$4 sm:$0xff]   ;;  %v2436_v27 = vld [vmem:[#allocation4 + $0x110] ss:$8 sps:$4 sm:$0xff]   ;;  %v2437_v28 = vld [vmem:[#allocation4 + $0x4] ss:$8 sps:$4 sm:$0xff]  }
  0x5c   : > { %1255 = vmatpush1.bf16.msra.mxu0 %v2411_v10  ;;  %v2439_v29 = vld [vmem:[#allocation4 + $0x104] ss:$8 sps:$4 sm:$0xff]   ;;  %v2441_v30 = vld [vmem:[#allocation4] ss:$8 sps:$4 sm:$0xff]   ;;  %v2443_v32 = vld [vmem:[#allocation4 + $0xf4] ss:$8 sps:$4 sm:$0xff]  }
  0x5d   : > { %1368 = vmatpush1.bf16.msra.mxu1 %v2412_v11  ;;  %1256 = vmatprep.subr.bf16.mxu0 %v2413_v12  ;;  %v2442_v31 = vld [vmem:[#allocation4 + $0x100] ss:$8 sps:$4 sm:$0xff]   ;;  %v2445_v33 = vld [vmem:[#allocation4 + $0x1f4] ss:$8 sps:$4 sm:$0xff]   ;;  %v2447_v34 = vld [vmem:[#allocation4 + $0xf0] ss:$8 sps:$4 sm:$0xff]  }
  0x5e   : > { %1369 = vmatprep.subr.bf16.mxu1 %v2415_v13  ;;  %v2448_v35 = vld [vmem:[#allocation4 + $0x1f0] ss:$8 sps:$4 sm:$0xff]   ;;  %v2449_v36 = vld [vmem:[#allocation4 + $0xe4] ss:$8 sps:$4 sm:$0xff]   ;;  %v2453_v38 = vld [vmem:[#allocation4 + $0xe0] ss:$8 sps:$4 sm:$0xff]  }
  0x5f   : > { %v2451_v37 = vld [vmem:[#allocation4 + $0x1e4] ss:$8 sps:$4 sm:$0xff]   ;;  %v2454_v39 = vld [vmem:[#allocation4 + $0x1e0] ss:$8 sps:$4 sm:$0xff]   ;;  %v2455_v40 = vld [vmem:[#allocation4 + $0xd4] ss:$8 sps:$4 sm:$0xff]  }
  0x60   : > { %1257 = vmatpush1.bf16.msra.mxu0 %v2417_v14  ;;  %v2457_v41 = vld [vmem:[#allocation4 + $0x1d4] ss:$8 sps:$4 sm:$0xff]   ;;  %v2459_v42 = vld [vmem:[#allocation4 + $0xd0] ss:$8 sps:$4 sm:$0xff]   ;;  %v2461_v44 = vld [vmem:[#allocation4 + $0xc4] ss:$8 sps:$4 sm:$0xff]  }
  0x61   : > { %1370 = vmatpush1.bf16.msra.mxu1 %v2418_v15  ;;  %1258 = vmatprep.subr.bf16.mxu0 %v2419_v16  ;;  %v2460_v43 = vld [vmem:[#allocation4 + $0x1d0] ss:$8 sps:$4 sm:$0xff]   ;;  %v2463_v45 = vld [vmem:[#allocation4 + $0x1c4] ss:$8 sps:$4 sm:$0xff]   ;;  %v2465_v50 = vld [vmem:[#allocation4 + $0xc0] ss:$8 sps:$4 sm:$0xff]  }
  0x62   : > { %1371 = vmatprep.subr.bf16.mxu1 %v2421_v17  ;;  %v279_v46 = vld [vmem:[%s2878_s17 + $0x8] sm:$0xff]  ;;  %v281_v48 = vld [vmem:[%s2878_s17 + $0x18] sm:$0xff]  ;;  %v278_v6 = vld [vmem:[%s2878_s17] sm:$0xff]  ;;  %s2099_s25 = sshll.u32 %s2085_s22, 4  ;;  %vm1982_vm0 = vcmask 64512  }
  0x63   : > { %v287_v47 = vld [vmem:[%s2878_s17 + $0x48] sm:$0xff]  ;;  %v289_v49 = vld [vmem:[%s2878_s17 + $0x58] sm:$0xff]  ;;  %v286_v7 = vld [vmem:[%s2878_s17 + $0x40] sm:$0xff]  ;;  %p272_p7 = scmp.lt.s32.totalorder %s2099_s25, 31 }
  0x64   : > { %1259 = vmatpush1.bf16.msra.mxu0 %v2423_v18  ;;  %v2466_v51 = vld [vmem:[#allocation4 + $0x1c0] ss:$8 sps:$4 sm:$0xff]   ;;  %v2467_v52 = vld [vmem:[#allocation4 + $0xb4] ss:$8 sps:$4 sm:$0xff]   ;;  %v407_v53 = vpack.c.bf16 %v287_v47, %v279_v46  ;;  %v409_v54 = vpack.c.bf16 %v289_v49, %v281_v48  ;;  %v2471_v56 = vld [vmem:[#allocation4 + $0xb0] ss:$8 sps:$4 sm:$0xff]   ;;  %v406_v16 = vpack.c.bf16 %v286_v7, %v278_v6 }
  0x65   : > { %1372 = vmatpush1.bf16.msra.mxu1 %v2424_v19  ;;  %1260 = vmatprep.subr.bf16.mxu0 %v2425_v20  ;;  %v2469_v55 = vld [vmem:[#allocation4 + $0x1b4] ss:$8 sps:$4 sm:$0xff]   ;;  %v2472_v57 = vld [vmem:[#allocation4 + $0x1b0] ss:$8 sps:$4 sm:$0xff]   ;;  %v2473_v58 = vld [vmem:[#allocation4 + $0xa4] ss:$8 sps:$4 sm:$0xff]  }
  0x66   : > { %1373 = vmatprep.subr.bf16.mxu1 %v2427_v21  ;;  %1282 = vmatprep.mubr.bf16.mxu0 %v407_v53  ;;  %v2475_v59 = vld [vmem:[#allocation4 + $0x1a4] ss:$8 sps:$4 sm:$0xff]   ;;  %v2477_v60 = vld [vmem:[#allocation4 + $0xa0] ss:$8 sps:$4 sm:$0xff]   ;;  %v2479_v62 = vld [vmem:[#allocation4 + $0x94] ss:$8 sps:$4 sm:$0xff]  }
  0x67   : > { %1395 = vmatprep.mubr.bf16.mxu1 %v409_v54  ;;  %v2478_v61 = vld [vmem:[#allocation4 + $0x1a0] ss:$8 sps:$4 sm:$0xff]   ;;  %v2481_v63 = vld [vmem:[#allocation4 + $0x194] ss:$8 sps:$4 sm:$0xff]   ;;  %v2483_v0 = vld [vmem:[#allocation4 + $0x90] ss:$8 sps:$4 sm:$0xff]  }
  0x68   : > { %1261 = vmatpush1.bf16.msra.mxu0 %v2429_v22  ;;  %v2484_v1 = vld [vmem:[#allocation4 + $0x190] ss:$8 sps:$4 sm:$0xff]   ;;  %v2485_v2 = vld [vmem:[#allocation4 + $0x84] ss:$8 sps:$4 sm:$0xff]   ;;  %v2489_v4 = vld [vmem:[#allocation4 + $0x80] ss:$8 sps:$4 sm:$0xff]  }
  0x69   : > { %1374 = vmatpush1.bf16.msra.mxu1 %v2430_v23  ;;  %1262 = vmatprep.subr.bf16.mxu0 %v2431_v24  ;;  %v2487_v3 = vld [vmem:[#allocation4 + $0x184] ss:$8 sps:$4 sm:$0xff]   ;;  %v2490_v5 = vld [vmem:[#allocation4 + $0x180] ss:$8 sps:$4 sm:$0xff]   ;;  %v280_v8 = vld [vmem:[%s2878_s17 + $0x10] sm:$0xff]  ;;  %s3305_s25 = smov (!%p272_p7, %s2099_s25), 31 }
  0x6a   : > { %1375 = vmatprep.subr.bf16.mxu1 %v2433_v25  ;;  %v288_v9 = vld [vmem:[%s2878_s17 + $0x50] sm:$0xff]  ;;  %v295_v14 = vld [vmem:[%s2878_s17 + $0x88] sm:$0xff]  ;;  %v297_v18 = vld [vmem:[%s2878_s17 + $0x98] sm:$0xff]  ;;  %s2100_s12 = sshll.u32 %s3305_s25, 3 }
  0x6b   : > { %v2493_v10 = vld [vmem:[#allocation4 + $0x274] ss:$8 sps:$4 sm:$0xff]   ;;  %v2491_v12 = vld [vmem:[#allocation4 + $0x270] ss:$8 sps:$4 sm:$0xff]   ;;  %v303_v15 = vld [vmem:[%s2878_s17 + $0xc8] sm:$0xff]  ;;  %v408_v17 = vpack.c.bf16 %v288_v9, %v280_v8  ;;  %s3209_s18 = scalar_lea.vmem %s3277_s5, %s2100_s12 }
  0x6c   : > { %1263 = vmatpush1.bf16.msra.mxu0 %v2435_v26  ;;  %v2496_v11 = vld [vmem:[#allocation4 + $0x374] ss:$8 sps:$4 sm:$0xff]   ;;  %v2494_v13 = vld [vmem:[#allocation4 + $0x370] ss:$8 sps:$4 sm:$0xff]   ;;  %v2499_v20 = vld [vmem:[#allocation4 + $0x264] ss:$8 sps:$4 sm:$0xff]   ;;  %v415_v23 = vpack.c.bf16 %v303_v15, %v295_v14 }
  0x6d   : > { %1376 = vmatpush1.bf16.msra.mxu1 %v2436_v27  ;;  %1264 = vmatprep.subr.bf16.mxu0 %v2437_v28  ;;  %v305_v19 = vld [vmem:[%s2878_s17 + $0xd8] sm:$0xff]  ;;  %v2502_v21 = vld [vmem:[#allocation4 + $0x364] ss:$8 sps:$4 sm:$0xff]   ;;  %v2497_v22 = vld [vmem:[#allocation4 + $0x260] ss:$8 sps:$4 sm:$0xff]  }
  0x6e   : > { %1377 = vmatprep.subr.bf16.mxu1 %v2439_v29  ;;  %v417_v24 = vpack.c.bf16 %v305_v19, %v297_v18  ;;  %v2500_v25 = vld [vmem:[#allocation4 + $0x360] ss:$8 sps:$4 sm:$0xff]   ;;  %v296_v28 = vld [vmem:[%s2878_s17 + $0x90] sm:$0xff]  ;;  %v345_v14 = vld [vmem:[%s2878_s17 + $0x218] sm:$0xff] }
  0x6f   : > { %v294_v26 = vld [vmem:[%s2878_s17 + $0x80] sm:$0xff]  ;;  %v304_v29 = vld [vmem:[%s2878_s17 + $0xd0] sm:$0xff]  ;;  %v327_v54 = vld [vmem:[%s2878_s17 + $0x188] sm:$0xff] }
  0x70   : > { %1265 = vmatpush1.bf16.msra.mxu0 %v2441_v30  ;;  %v302_v27 = vld [vmem:[%s2878_s17 + $0xc0] sm:$0xff]  ;;  %v2505_v30 = vld [vmem:[#allocation4 + $0x254] ss:$8 sps:$4 sm:$0xff]   ;;  %v2518_v53 = vld [vmem:[#allocation4 + $0x330] ss:$8 sps:$4 sm:$0xff]  }
  0x71   : > { %1378 = vmatpush1.bf16.msra.mxu1 %v2442_v31  ;;  %1266 = vmatprep.subr.bf16.mxu0 %v2443_v32  ;;  %v2508_v31 = vld [vmem:[#allocation4 + $0x354] ss:$8 sps:$4 sm:$0xff]   ;;  %v2503_v32 = vld [vmem:[#allocation4 + $0x250] ss:$8 sps:$4 sm:$0xff]   ;;  %v310_v46 = vld [vmem:[%s2878_s17 + $0x100] sm:$0xff] }
  0x72   : > { %1379 = vmatprep.subr.bf16.mxu1 %v2445_v33  ;;  %v2506_v33 = vld [vmem:[#allocation4 + $0x350] ss:$8 sps:$4 sm:$0xff]   ;;  %v318_v47 = vld [vmem:[%s2878_s17 + $0x140] sm:$0xff]  ;;  %v2529_v6 = vld [vmem:[#allocation4 + $0x214] ss:$8 sps:$4 sm:$0xff]  }
  0x73   : > { %v312_v48 = vld [vmem:[%s2878_s17 + $0x110] sm:$0xff]  ;;  %v353_v15 = vld [vmem:[%s2878_s17 + $0x258] sm:$0xff]  ;;  %v2533_v18 = vld [vmem:[#allocation4 + $0x200] ss:$8 sps:$4 sm:$0xff]  }
  0x74   : > { %1267 = vmatpush2.bf16.msra.mxu0 %v2447_v34  ;;  %v311_v34 = vld [vmem:[%s2878_s17 + $0x108] sm:$0xff]  ;;  %v320_v49 = vld [vmem:[%s2878_s17 + $0x150] sm:$0xff] }
  0x75   : > { %1380 = vmatpush2.bf16.msra.mxu1 %v2448_v35  ;;  %1268 = vmatprep.subr.bf16.mxu0 %v2449_v36  ;;  %v319_v35 = vld [vmem:[%s2878_s17 + $0x148] sm:$0xff]  ;;  %v414_v36 = vpack.c.bf16 %v302_v27, %v294_v26  ;;  %v2532_v7 = vld [vmem:[#allocation4 + $0x314] ss:$8 sps:$4 sm:$0xff]   ;;  %v2527_v8 = vld [vmem:[#allocation4 + $0x210] ss:$8 sps:$4 sm:$0xff]  }
  0x76   : > { %1381 = vmatprep.subr.bf16.mxu1 %v2451_v37  ;;  %v416_v37 = vpack.c.bf16 %v304_v29, %v296_v28  ;;  %v2530_v9 = vld [vmem:[#allocation4 + $0x310] ss:$8 sps:$4 sm:$0xff]   ;;  %v2541_v26 = vld [vmem:[#allocation4 + $0x2f4] ss:$8 sps:$4 sm:$0xff]  }
  0x77   : > { %v2544_v27 = vld [vmem:[#allocation4 + $0x3f4] ss:$8 sps:$4 sm:$0xff]   ;;  %v2539_v28 = vld [vmem:[#allocation4 + $0x2f0] ss:$8 sps:$4 sm:$0xff]  }
  0x78   : > { %1269 = vmatpush2.bf16.msra.mxu0 %v2453_v38  ;;  %v313_v38 = vld [vmem:[%s2878_s17 + $0x118] sm:$0xff] }
  0x79   : > { %1382 = vmatpush2.bf16.msra.mxu1 %v2454_v39  ;;  %1270 = vmatprep.subr.bf16.mxu0 %v2455_v40  ;;  %v321_v39 = vld [vmem:[%s2878_s17 + $0x158] sm:$0xff]  ;;  %v2511_v40 = vld [vmem:[#allocation4 + $0x244] ss:$8 sps:$4 sm:$0xff]  }
  0x7a   : > { %1383 = vmatprep.subr.bf16.mxu1 %v2457_v41  ;;  %v2514_v41 = vld [vmem:[#allocation4 + $0x344] ss:$8 sps:$4 sm:$0xff]   ;;  %v2542_v29 = vld [vmem:[#allocation4 + $0x3f0] ss:$8 sps:$4 sm:$0xff]  }
  0x7c   : > { %1271 = vmatpush2.bf16.msra.mxu0 %v2459_v42  ;;  %v2509_v42 = vld [vmem:[#allocation4 + $0x240] ss:$8 sps:$4 sm:$0xff]  }
  0x7d   : > { %1384 = vmatpush2.bf16.msra.mxu1 %v2460_v43  ;;  %1272 = vmatprep.subr.bf16.mxu0 %v2461_v44  ;;  %v423_v43 = vpack.c.bf16 %v319_v35, %v311_v34  ;;  %v425_v44 = vpack.c.bf16 %v321_v39, %v313_v38  ;;  %v361_v34 = vld [vmem:[%s2878_s17 + $0x298] sm:$0xff]  ;;  %v2545_v38 = vld [vmem:[#allocation4 + $0x2e0] ss:$8 sps:$4 sm:$0xff]  }
  0x7e   : > { %1385 = vmatprep.subr.bf16.mxu1 %v2463_v45  ;;  %v2512_v45 = vld [vmem:[#allocation4 + $0x340] ss:$8 sps:$4 sm:$0xff]   ;;  %v369_v35 = vld [vmem:[%s2878_s17 + $0x2d8] sm:$0xff] }
  0x80   : > { %1273 = vmatpush2.bf16.msra.mxu0 %v2465_v50  ;;  %v2517_v50 = vld [vmem:[#allocation4 + $0x234] ss:$8 sps:$4 sm:$0xff]  }
  0x81   : > { %1386 = vmatpush2.bf16.msra.mxu1 %v2466_v51  ;;  %1274 = vmatprep.subr.bf16.mxu0 %v2467_v52  ;;  %v2520_v51 = vld [vmem:[#allocation4 + $0x334] ss:$8 sps:$4 sm:$0xff]   ;;  %v2515_v52 = vld [vmem:[#allocation4 + $0x230] ss:$8 sps:$4 sm:$0xff]  }
  0x82   : > { %1387 = vmatprep.subr.bf16.mxu1 %v2469_v55  ;;  %v335_v55 = vld [vmem:[%s2878_s17 + $0x1c8] sm:$0xff] }
  0x84   : > { %1275 = vmatpush2.bf16.msra.mxu0 %v2471_v56  ;;  %v422_v56 = vpack.c.bf16 %v318_v47, %v310_v46  ;;  %v2553_v46 = vld [vmem:[#allocation4 + $0x2d4] ss:$8 sps:$4 sm:$0xff]  }
  0x85   : > { %1388 = vmatpush2.bf16.msra.mxu1 %v2472_v57  ;;  %1276 = vmatprep.subr.bf16.mxu0 %v2473_v58  ;;  %v424_v57 = vpack.c.bf16 %v320_v49, %v312_v48  ;;  %v329_v58 = vld [vmem:[%s2878_s17 + $0x198] sm:$0xff] }
  0x86   : > { %1389 = vmatprep.subr.bf16.mxu1 %v2475_v59  ;;  %v337_v59 = vld [vmem:[%s2878_s17 + $0x1d8] sm:$0xff] }
  0x87   : > { %v2556_v47 = vld [vmem:[#allocation4 + $0x3d4] ss:$8 sps:$4 sm:$0xff]   ;;  %v2551_v48 = vld [vmem:[#allocation4 + $0x2d0] ss:$8 sps:$4 sm:$0xff]  }
  0x88   : > { %1277 = vmatpush2.bf16.msra.mxu0 %v2477_v60  ;;  %v2523_v60 = vld [vmem:[#allocation4 + $0x224] ss:$8 sps:$4 sm:$0xff]   ;;  %v2554_v49 = vld [vmem:[#allocation4 + $0x3d0] ss:$8 sps:$4 sm:$0xff]  }
  0x89   : > { %1390 = vmatpush2.bf16.msra.mxu1 %v2478_v61  ;;  %1278 = vmatprep.subr.bf16.mxu0 %v2479_v62  ;;  %v2526_v61 = vld [vmem:[#allocation4 + $0x324] ss:$8 sps:$4 sm:$0xff]   ;;  %v2521_v62 = vld [vmem:[#allocation4 + $0x220] ss:$8 sps:$4 sm:$0xff]  }
  0x8a   : > { %1391 = vmatprep.subr.bf16.mxu1 %v2481_v63  ;;  %v431_v63 = vpack.c.bf16 %v335_v55, %v327_v54  ;;  %v377_v54 = vld [vmem:[%s2878_s17 + $0x318] sm:$0xff] }
  0x8b   : > { %v385_v55 = vld [vmem:[%s2878_s17 + $0x358] sm:$0xff] }
  0x8c   : > { %1279 = vmatpush2.bf16.msra.mxu0 %v2483_v0  ;;  %v433_v0 = vpack.c.bf16 %v337_v59, %v329_v58  ;;  %v457_v59 = vpack.c.bf16 %v385_v55, %v377_v54  ;;  %v315_v54 = vld [vmem:[%s2878_s17 + $0x128] sm:$0xff] }
  0x8d   : > { %1392 = vmatpush2.bf16.msra.mxu1 %v2484_v1  ;;  %1280 = vmatprep.subr.bf16.mxu0 %v2485_v2  ;;  %v2524_v1 = vld [vmem:[#allocation4 + $0x320] ss:$8 sps:$4 sm:$0xff]  }
  0x8e   : > { %1393 = vmatprep.subr.bf16.mxu1 %v2487_v3  ;;  %v326_v2 = vld [vmem:[%s2878_s17 + $0x180] sm:$0xff]  ;;  %v323_v55 = vld [vmem:[%s2878_s17 + $0x168] sm:$0xff] }
  0x8f   : > { %v334_v3 = vld [vmem:[%s2878_s17 + $0x1c0] sm:$0xff] }
  0x90   : > { %1281 = vmatpush2.bf16.msra.mxu0 %v2489_v4  ;;  %v328_v4 = vld [vmem:[%s2878_s17 + $0x190] sm:$0xff] }
  0x91   : > { %1394 = vmatpush2.bf16.msra.mxu1 %v2490_v5  ;;  %1476 = vmatprep.subr.bf16.mxu0 %v2493_v10  ;;  %v336_v5 = vld [vmem:[%s2878_s17 + $0x1d0] sm:$0xff]  ;;  %v343_v10 = vld [vmem:[%s2878_s17 + $0x208] sm:$0xff] }
  0x92   : > { %1589 = vmatprep.subr.bf16.mxu1 %v2496_v11  ;;  %v351_v11 = vld [vmem:[%s2878_s17 + $0x248] sm:$0xff] }
  0x93   : > { %1283 = vmatmul.mubr.bf16.vlgmr.msra.gmra.mxu0 %v406_v16  ;;  %v2535_v16 = vld [vmem:[#allocation4 + $0x204] ss:$8 sps:$4 sm:$0xff]   ;;  %v439_v19 = vpack.c.bf16 %v351_v11, %v343_v10  ;;  %v2563_v10 = vld [vmem:[#allocation4 + $0x2b0] ss:$8 sps:$4 sm:$0xff]  }
  0x94   : > { %1396 = vmatmul.mubr.bf16.vlgmr.msra.gmra.mxu1 %v408_v17  ;;  %1477 = vmatpush1.bf16.msra.mxu0 %v2491_v12  ;;  %v430_v12 = vpack.c.bf16 %v334_v3, %v326_v2  ;;  %v2538_v17 = vld [vmem:[#allocation4 + $0x304] ss:$8 sps:$4 sm:$0xff]   ;;  %v2565_v2 = vld [vmem:[#allocation4 + $0x2b4] ss:$8 sps:$4 sm:$0xff]   ;;  %v2566_v11 = vld [vmem:[#allocation4 + $0x3b0] ss:$8 sps:$4 sm:$0xff]  }
  0x95   : > { %1590 = vmatpush1.bf16.msra.mxu1 %v2494_v13  ;;  %1478 = vmatprep.subr.bf16.mxu0 %v2499_v20  ;;  %v432_v13 = vpack.c.bf16 %v336_v5, %v328_v4  ;;  %v441_v20 = vpack.c.bf16 %v353_v15, %v345_v14  ;;  %v2568_v3 = vld [vmem:[#allocation4 + $0x3b4] ss:$8 sps:$4 sm:$0xff]   ;;  %v391_v4 = vld [vmem:[%s2878_s17 + $0x388] sm:$0xff] }
  0x96   : > { %1591 = vmatprep.subr.bf16.mxu1 %v2502_v21  ;;  %1292 = vmatprep.mubr.bf16.mxu0 %v415_v23  ;;  %v2536_v21 = vld [vmem:[#allocation4 + $0x300] ss:$8 sps:$4 sm:$0xff]  }
  0x97   : > { %1405 = vmatprep.mubr.bf16.mxu1 %v417_v24  ;;  %v350_v23 = vld [vmem:[%s2878_s17 + $0x240] sm:$0xff]  ;;  %v344_v24 = vld [vmem:[%s2878_s17 + $0x210] sm:$0xff] }
  0x98   : > { %1479 = vmatpush1.bf16.msra.mxu0 %v2497_v22  ;;  %v342_v22 = vld [vmem:[%s2878_s17 + $0x200] sm:$0xff] }
  0x99   : > { %1592 = vmatpush1.bf16.msra.mxu1 %v2500_v25  ;;  %1480 = vmatprep.subr.bf16.mxu0 %v2505_v30  ;;  %v352_v25 = vld [vmem:[%s2878_s17 + $0x250] sm:$0xff]  ;;  %v359_v30 = vld [vmem:[%s2878_s17 + $0x288] sm:$0xff] }
  0x9a   : > { %1593 = vmatprep.subr.bf16.mxu1 %v2508_v31  ;;  %v367_v31 = vld [vmem:[%s2878_s17 + $0x2c8] sm:$0xff] }
  0x9b   : > { %1293 = vmatmul.mubr.bf16.gmra.mxu0 %v414_v36  ;;  %v2547_v36 = vld [vmem:[#allocation4 + $0x2e4] ss:$8 sps:$4 sm:$0xff]   ;;  %v447_v39 = vpack.c.bf16 %v367_v31, %v359_v30  ;;  %v2575_v30 = vld [vmem:[#allocation4 + $0x290] ss:$8 sps:$4 sm:$0xff]  }
  0x9c   : > { %1406 = vmatmul.mubr.bf16.gmra.mxu1 %v416_v37  ;;  %1481 = vmatpush1.bf16.msra.mxu0 %v2503_v32  ;;  %v438_v32 = vpack.c.bf16 %v350_v23, %v342_v22  ;;  %v2550_v37 = vld [vmem:[#allocation4 + $0x3e4] ss:$8 sps:$4 sm:$0xff]   ;;  %v2577_v22 = vld [vmem:[#allocation4 + $0x294] ss:$8 sps:$4 sm:$0xff]   ;;  %v2578_v31 = vld [vmem:[#allocation4 + $0x390] ss:$8 sps:$4 sm:$0xff]  }
  0x9d   : > { %1594 = vmatpush1.bf16.msra.mxu1 %v2506_v33  ;;  %1482 = vmatprep.subr.bf16.mxu0 %v2511_v40  ;;  %v440_v33 = vpack.c.bf16 %v352_v25, %v344_v24  ;;  %v449_v40 = vpack.c.bf16 %v369_v35, %v361_v34  ;;  %v2580_v23 = vld [vmem:[#allocation4 + $0x394] ss:$8 sps:$4 sm:$0xff]   ;;  %v283_v24 = vld [vmem:[%s2878_s17 + $0x28] sm:$0xff] }
  0x9e   : > { %1595 = vmatprep.subr.bf16.mxu1 %v2514_v41  ;;  %1302 = vmatprep.mubr.bf16.mxu0 %v423_v43  ;;  %v2548_v41 = vld [vmem:[#allocation4 + $0x3e0] ss:$8 sps:$4 sm:$0xff]  }
  0x9f   : > { %1415 = vmatprep.mubr.bf16.mxu1 %v425_v44  ;;  %v366_v43 = vld [vmem:[%s2878_s17 + $0x2c0] sm:$0xff]  ;;  %v360_v44 = vld [vmem:[%s2878_s17 + $0x290] sm:$0xff] }
  0xa0   : > { %1483 = vmatpush1.bf16.msra.mxu0 %v2509_v42  ;;  %v358_v42 = vld [vmem:[%s2878_s17 + $0x280] sm:$0xff] }
  0xa1   : > { %1596 = vmatpush1.bf16.msra.mxu1 %v2512_v45  ;;  %1484 = vmatprep.subr.bf16.mxu0 %v2517_v50  ;;  %v368_v45 = vld [vmem:[%s2878_s17 + $0x2d0] sm:$0xff]  ;;  %v375_v50 = vld [vmem:[%s2878_s17 + $0x308] sm:$0xff] }
  0xa2   : > { %1597 = vmatprep.subr.bf16.mxu1 %v2520_v51  ;;  %v383_v51 = vld [vmem:[%s2878_s17 + $0x348] sm:$0xff] }
  0xa3   : > { %1303 = vmatmul.mubr.bf16.gmra.mxu0 %v422_v56  ;;  %v2559_v56 = vld [vmem:[#allocation4 + $0x2c4] ss:$8 sps:$4 sm:$0xff]   ;;  %v455_v58 = vpack.c.bf16 %v383_v51, %v375_v50  ;;  %v2581_v34 = vld [vmem:[#allocation4 + $0x280] ss:$8 sps:$4 sm:$0xff]  }
  0xa4   : > { %1416 = vmatmul.mubr.bf16.gmra.mxu1 %v424_v57  ;;  %1485 = vmatpush1.bf16.msra.mxu0 %v2515_v52  ;;  %v446_v52 = vpack.c.bf16 %v366_v43, %v358_v42  ;;  %v2562_v57 = vld [vmem:[#allocation4 + $0x3c4] ss:$8 sps:$4 sm:$0xff]  }
  0xa5   : > { %1598 = vmatpush1.bf16.msra.mxu1 %v2518_v53  ;;  %1486 = vmatprep.subr.bf16.mxu0 %v2523_v60  ;;  %v448_v53 = vpack.c.bf16 %v368_v45, %v360_v44  ;;  %v2557_v60 = vld [vmem:[#allocation4 + $0x2c0] ss:$8 sps:$4 sm:$0xff]   ;;  %v301_v44 = vld [vmem:[%s2878_s17 + $0xb8] sm:$0xff] }
  0xa6   : > { %1599 = vmatprep.subr.bf16.mxu1 %v2526_v61  ;;  %1312 = vmatprep.mubr.bf16.mxu0 %v431_v63  ;;  %v2560_v61 = vld [vmem:[#allocation4 + $0x3c0] ss:$8 sps:$4 sm:$0xff]   ;;  %v309_v45 = vld [vmem:[%s2878_s17 + $0xf8] sm:$0xff] }
  0xa7   : > { %1425 = vmatprep.mubr.bf16.mxu1 %v433_v0  ;;  %v382_v63 = vld [vmem:[%s2878_s17 + $0x340] sm:$0xff]  ;;  %v376_v0 = vld [vmem:[%s2878_s17 + $0x310] sm:$0xff]  ;;  %v299_v42 = vld [vmem:[%s2878_s17 + $0xa8] sm:$0xff] }
  0xa8   : > { %1487 = vmatpush1.bf16.msra.mxu0 %v2521_v62  ;;  %v374_v62 = vld [vmem:[%s2878_s17 + $0x300] sm:$0xff]  ;;  %v307_v43 = vld [vmem:[%s2878_s17 + $0xe8] sm:$0xff] }
  0xa9   : > { %1600 = vmatpush1.bf16.msra.mxu1 %v2524_v1  ;;  %1488 = vmatprep.subr.bf16.mxu0 %v2529_v6  ;;  %v384_v1 = vld [vmem:[%s2878_s17 + $0x350] sm:$0xff]  ;;  %v454_v5 = vpack.c.bf16 %v382_v63, %v374_v62  ;;  %v298_v50 = vld [vmem:[%s2878_s17 + $0xa0] sm:$0xff] }
  0xaa   : > { %1601 = vmatprep.subr.bf16.mxu1 %v2532_v7  ;;  %v456_v6 = vpack.c.bf16 %v384_v1, %v376_v0  ;;  %v399_v7 = vld [vmem:[%s2878_s17 + $0x3c8] sm:$0xff]  ;;  %v306_v51 = vld [vmem:[%s2878_s17 + $0xe0] sm:$0xff]  ;;  %v316_v0 = vld [vmem:[%s2878_s17 + $0x130] sm:$0xff] }
  0xab   : > { %1313 = vmatmul.mubr.bf16.gmra.mxu0 %v430_v12  ;;  %v2571_v12 = vld [vmem:[#allocation4 + $0x2a4] ss:$8 sps:$4 sm:$0xff]   ;;  %v463_v14 = vpack.c.bf16 %v399_v7, %v391_v4  ;;  %v324_v1 = vld [vmem:[%s2878_s17 + $0x170] sm:$0xff]  ;;  %v333_v4 = vld [vmem:[%s2878_s17 + $0x1b8] sm:$0xff] }
  0xac   : > { %1426 = vmatmul.mubr.bf16.gmra.mxu1 %v432_v13  ;;  %1489 = vmatpush1.bf16.msra.mxu0 %v2527_v8  ;;  %v393_v8 = vld [vmem:[%s2878_s17 + $0x398] sm:$0xff]  ;;  %v2574_v13 = vld [vmem:[#allocation4 + $0x3a4] ss:$8 sps:$4 sm:$0xff]   ;;  %v428_v7 = vpack.c.bf16 %v324_v1, %v316_v0  ;;  %v2589_v0 = vld [vmem:[#allocation6 + $0x70] sm:$0xff]  }
  0xad   : > { %1602 = vmatpush1.bf16.msra.mxu1 %v2530_v9  ;;  %1490 = vmatprep.subr.bf16.mxu0 %v2535_v16  ;;  %v401_v9 = vld [vmem:[%s2878_s17 + $0x3d8] sm:$0xff]  ;;  %v2569_v16 = vld [vmem:[#allocation4 + $0x2a0] ss:$8 sps:$4 sm:$0xff]   ;;  %v2590_v1 = vld [vmem:[#allocation6 + $0x30] sm:$0xff]  }
  0xae   : > { %1603 = vmatprep.subr.bf16.mxu1 %v2538_v17  ;;  %1322 = vmatprep.mubr.bf16.mxu0 %v439_v19  ;;  %v465_v15 = vpack.c.bf16 %v401_v9, %v393_v8  ;;  %v2572_v17 = vld [vmem:[#allocation4 + $0x3a0] ss:$8 sps:$4 sm:$0xff]  }
  0xaf   : > { %1435 = vmatprep.mubr.bf16.mxu1 %v441_v20  ;;  %v398_v19 = vld [vmem:[%s2878_s17 + $0x3c0] sm:$0xff]  ;;  %v392_v20 = vld [vmem:[%s2878_s17 + $0x390] sm:$0xff] }
  0xb0   : > { %1491 = vmatpush1.bf16.msra.mxu0 %v2533_v18  ;;  %v390_v18 = vld [vmem:[%s2878_s17 + $0x380] sm:$0xff] }
  0xb1   : > { %1604 = vmatpush1.bf16.msra.mxu1 %v2536_v21  ;;  %1492 = vmatprep.subr.bf16.mxu0 %v2541_v26  ;;  %v400_v21 = vld [vmem:[%s2878_s17 + $0x3d0] sm:$0xff]  ;;  %v462_v25 = vpack.c.bf16 %v398_v19, %v390_v18  ;;  %v314_v62 = vld [vmem:[%s2878_s17 + $0x120] sm:$0xff] }
  0xb2   : > { %1605 = vmatprep.subr.bf16.mxu1 %v2544_v27  ;;  %v464_v26 = vpack.c.bf16 %v400_v21, %v392_v20  ;;  %v291_v27 = vld [vmem:[%s2878_s17 + $0x68] sm:$0xff]  ;;  %v322_v63 = vld [vmem:[%s2878_s17 + $0x160] sm:$0xff] }
  0xb3   : > { %1323 = vmatmul.mubr.bf16.gmra.mxu0 %v438_v32  ;;  %v2583_v32 = vld [vmem:[#allocation4 + $0x284] ss:$8 sps:$4 sm:$0xff]   ;;  %v411_v35 = vpack.c.bf16 %v291_v27, %v283_v24  ;;  %v348_v24 = vld [vmem:[%s2878_s17 + $0x230] sm:$0xff] }
  0xb4   : > { %1436 = vmatmul.mubr.bf16.gmra.mxu1 %v440_v33  ;;  %1493 = vmatpush2.bf16.msra.mxu0 %v2539_v28  ;;  %v285_v28 = vld [vmem:[%s2878_s17 + $0x38] sm:$0xff]  ;;  %v2586_v33 = vld [vmem:[#allocation4 + $0x384] ss:$8 sps:$4 sm:$0xff]  }
  0xb5   : > { %1606 = vmatpush2.bf16.msra.mxu1 %v2542_v29  ;;  %1494 = vmatprep.subr.bf16.mxu0 %v2547_v36  ;;  %v293_v29 = vld [vmem:[%s2878_s17 + $0x78] sm:$0xff]  ;;  %v371_v27 = vld [vmem:[%s2878_s17 + $0x2e8] sm:$0xff] }
  0xb6   : > { %1607 = vmatprep.subr.bf16.mxu1 %v2550_v37  ;;  %1332 = vmatprep.mubr.bf16.mxu0 %v447_v39  ;;  %v413_v36 = vpack.c.bf16 %v293_v29, %v285_v28  ;;  %v2584_v37 = vld [vmem:[#allocation4 + $0x380] ss:$8 sps:$4 sm:$0xff]   ;;  %v365_v28 = vld [vmem:[%s2878_s17 + $0x2b8] sm:$0xff] }
  0xb7   : > { %1445 = vmatprep.mubr.bf16.mxu1 %v449_v40  ;;  %v290_v39 = vld [vmem:[%s2878_s17 + $0x60] sm:$0xff]  ;;  %v284_v40 = vld [vmem:[%s2878_s17 + $0x30] sm:$0xff]  ;;  %v373_v29 = vld [vmem:[%s2878_s17 + $0x2f8] sm:$0xff] }
  0xb8   : > { %1495 = vmatpush2.bf16.msra.mxu0 %v2545_v38  ;;  %v282_v38 = vld [vmem:[%s2878_s17 + $0x20] sm:$0xff] }
  0xb9   : > { %1608 = vmatpush2.bf16.msra.mxu1 %v2548_v41  ;;  %1496 = vmatprep.subr.bf16.mxu0 %v2553_v46  ;;  %v292_v41 = vld [vmem:[%s2878_s17 + $0x70] sm:$0xff]  ;;  %v410_v46 = vpack.c.bf16 %v290_v39, %v282_v38  ;;  %v379_v38 = vld [vmem:[%s2878_s17 + $0x328] sm:$0xff] }
  0xba   : > { %1609 = vmatprep.subr.bf16.mxu1 %v2556_v47  ;;  %v412_v47 = vpack.c.bf16 %v292_v41, %v284_v40  ;;  %v387_v39 = vld [vmem:[%s2878_s17 + $0x368] sm:$0xff]  ;;  %v381_v40 = vld [vmem:[%s2878_s17 + $0x338] sm:$0xff] }
  0xbb   : > { %1333 = vmatmul.mubr.bf16.gmra.mxu0 %v446_v52  ;;  %v300_v52 = vld [vmem:[%s2878_s17 + $0xb0] sm:$0xff]  ;;  %v389_v41 = vld [vmem:[%s2878_s17 + $0x378] sm:$0xff] }
  0xbc   : > { %1446 = vmatmul.mubr.bf16.gmra.mxu1 %v448_v53  ;;  %1497 = vmatpush2.bf16.msra.mxu0 %v2551_v48  ;;  %v419_v48 = vpack.c.bf16 %v307_v43, %v299_v42  ;;  %v308_v53 = vld [vmem:[%s2878_s17 + $0xf0] sm:$0xff] }
  0xbd   : > { %1610 = vmatpush2.bf16.msra.mxu1 %v2554_v49  ;;  %1498 = vmatprep.subr.bf16.mxu0 %v2559_v56  ;;  %v421_v49 = vpack.c.bf16 %v309_v45, %v301_v44  ;;  %v317_v56 = vld [vmem:[%s2878_s17 + $0x138] sm:$0xff]  ;;  %v459_v44 = vpack.c.bf16 %v387_v39, %v379_v38  ;;  %v461_v45 = vpack.c.bf16 %v389_v41, %v381_v40 }
  0xbe   : > { %1611 = vmatprep.subr.bf16.mxu1 %v2562_v57  ;;  %1342 = vmatprep.mubr.bf16.mxu0 %v455_v58  ;;  %v325_v57 = vld [vmem:[%s2878_s17 + $0x178] sm:$0xff]  ;;  %v418_v58 = vpack.c.bf16 %v306_v51, %v298_v50  ;;  %v395_v50 = vld [vmem:[%s2878_s17 + $0x3a8] sm:$0xff] }
  0xbf   : > { %1455 = vmatprep.mubr.bf16.mxu1 %v457_v59  ;;  %v420_v59 = vpack.c.bf16 %v308_v53, %v300_v52  ;;  %v403_v51 = vld [vmem:[%s2878_s17 + $0x3e8] sm:$0xff]  ;;  %v397_v52 = vld [vmem:[%s2878_s17 + $0x3b8] sm:$0xff] }
  0xc0   : > { %1499 = vmatpush2.bf16.msra.mxu0 %v2557_v60  ;;  %v427_v60 = vpack.c.bf16 %v323_v55, %v315_v54  ;;  %v405_v53 = vld [vmem:[%s2878_s17 + $0x3f8] sm:$0xff] }
  0xc1   : > { %1612 = vmatpush2.bf16.msra.mxu1 %v2560_v61  ;;  %1500 = vmatprep.subr.bf16.mxu0 %v2565_v2  ;;  %v429_v61 = vpack.c.bf16 %v325_v57, %v317_v56  ;;  %v331_v2 = vld [vmem:[%s2878_s17 + $0x1a8] sm:$0xff]  ;;  %v467_v56 = vpack.c.bf16 %v403_v51, %v395_v50  ;;  %v469_v57 = vpack.c.bf16 %v405_v53, %v397_v52 }
  0xc2   : > { %1613 = vmatprep.subr.bf16.mxu1 %v2568_v3  ;;  %v339_v3 = vld [vmem:[%s2878_s17 + $0x1e8] sm:$0xff] }
  0xc3   : > { %1343 = vmatmul.mubr.bf16.gmra.mxu0 %v454_v5  ;;  %v341_v5 = vld [vmem:[%s2878_s17 + $0x1f8] sm:$0xff]  ;;  %v435_v8 = vpack.c.bf16 %v339_v3, %v331_v2 }
  0xc4   : > { %1456 = vmatmul.mubr.bf16.gmra.mxu1 %v456_v6  ;;  %1501 = vmatpush2.bf16.msra.mxu0 %v2563_v10  ;;  %v426_v6 = vpack.c.bf16 %v322_v63, %v314_v62  ;;  %v437_v9 = vpack.c.bf16 %v341_v5, %v333_v4  ;;  %v330_v10 = vld [vmem:[%s2878_s17 + $0x1a0] sm:$0xff]  ;;  %v396_v62 = vld [vmem:[%s2878_s17 + $0x3b0] sm:$0xff]  ;;  %v2591_v4 = vld [vmem:[#allocation6 + $0x68] sm:$0xff]  }
  0xc5   : > { %1614 = vmatpush2.bf16.msra.mxu1 %v2566_v11  ;;  %1502 = vmatprep.subr.bf16.mxu0 %v2571_v12  ;;  %v338_v11 = vld [vmem:[%s2878_s17 + $0x1e0] sm:$0xff]  ;;  %v332_v12 = vld [vmem:[%s2878_s17 + $0x1b0] sm:$0xff]  ;;  %v2592_v5 = vld [vmem:[#allocation6 + $0x28] sm:$0xff]  }
  0xc6   : > { %1615 = vmatprep.subr.bf16.mxu1 %v2574_v13  ;;  %1352 = vmatprep.mubr.bf16.mxu0 %v463_v14  ;;  %v340_v13 = vld [vmem:[%s2878_s17 + $0x1f0] sm:$0xff]  ;;  %v347_v14 = vld [vmem:[%s2878_s17 + $0x228] sm:$0xff]  ;;  %v434_v18 = vpack.c.bf16 %v338_v11, %v330_v10 }
  0xc7   : > { %1465 = vmatprep.mubr.bf16.mxu1 %v465_v15  ;;  %v355_v15 = vld [vmem:[%s2878_s17 + $0x268] sm:$0xff]  ;;  %v436_v19 = vpack.c.bf16 %v340_v13, %v332_v12  ;;  %v404_v63 = vld [vmem:[%s2878_s17 + $0x3f0] sm:$0xff] }
  0xc8   : > { %1503 = vmatpush2.bf16.msra.mxu0 %v2569_v16  ;;  %v349_v16 = vld [vmem:[%s2878_s17 + $0x238] sm:$0xff]  ;;  %v443_v20 = vpack.c.bf16 %v355_v15, %v347_v14  ;;  %v468_v3 = vpack.c.bf16 %v404_v63, %v396_v62  ;;  %v2597_v10 = vld [vmem:[#allocation6 + $0x50] sm:$0xff]   ;;  %v2599_v12 = vld [vmem:[#allocation6 + $0x48] sm:$0xff]  }
  0xc9   : > { %1616 = vmatpush2.bf16.msra.mxu1 %v2572_v17  ;;  %1504 = vmatprep.subr.bf16.mxu0 %v2577_v22  ;;  %v357_v17 = vld [vmem:[%s2878_s17 + $0x278] sm:$0xff]  ;;  %v346_v22 = vld [vmem:[%s2878_s17 + $0x220] sm:$0xff]  ;;  %v2598_v11 = vld [vmem:[#allocation6 + $0x10] sm:$0xff]  }
  0xca   : > { %1617 = vmatprep.subr.bf16.mxu1 %v2580_v23  ;;  %v445_v21 = vpack.c.bf16 %v357_v17, %v349_v16  ;;  %v354_v23 = vld [vmem:[%s2878_s17 + $0x260] sm:$0xff]  ;;  %v2600_v13 = vld [vmem:[#allocation6 + $0x8] sm:$0xff]   ;;  %v600_v16 = vlaneseq }
  0xcb   : > { %1353 = vmatmul.mubr.bf16.gmra.mxu0 %v462_v25  ;;  %v356_v25 = vld [vmem:[%s2878_s17 + $0x270] sm:$0xff]  ;;  %v2601_v14 = vld [vmem:[#allocation6 + $0x40] sm:$0xff]  }
  0xcc   : > { %1466 = vmatmul.mubr.bf16.gmra.mxu1 %v464_v26  ;;  %1505 = vmatpush2.bf16.msra.mxu0 %v2575_v30  ;;  %v363_v26 = vld [vmem:[%s2878_s17 + $0x2a8] sm:$0xff]  ;;  %v442_v30 = vpack.c.bf16 %v354_v23, %v346_v22  ;;  %v2602_v15 = vld [vmem:[#allocation6] sm:$0xff]   ;;  %v601_v17 = vshrl.u32 %v600_v16, 7 }
  0xcd   : > { %1618 = vmatpush2.bf16.msra.mxu1 %v2578_v31  ;;  %1506 = vmatprep.subr.bf16.mxu0 %v2583_v32  ;;  %v444_v31 = vpack.c.bf16 %v356_v25, %v348_v24  ;;  %v451_v32 = vpack.c.bf16 %v371_v27, %v363_v26 }
  0xce   : > { %1619 = vmatprep.subr.bf16.mxu1 %v2586_v33  ;;  %1508 = vmatprep.mubr.bf16.mxu0 %v411_v35  ;;  %v453_v33 = vpack.c.bf16 %v373_v29, %v365_v28  ;;  %v370_v35 = vld [vmem:[%s2878_s17 + $0x2e0] sm:$0xff] }
  0xcf   : > { %1621 = vmatprep.mubr.bf16.mxu1 %v413_v36  ;;  %v364_v36 = vld [vmem:[%s2878_s17 + $0x2b0] sm:$0xff] }
  0xd0   : > { %1507 = vmatpush2.bf16.msra.mxu0 %v2581_v34  ;;  %v362_v34 = vld [vmem:[%s2878_s17 + $0x2a0] sm:$0xff] }
  0xd1   : > { %1620 = vmatpush2.bf16.msra.mxu1 %v2584_v37  ;;  %v372_v37 = vld [vmem:[%s2878_s17 + $0x2f0] sm:$0xff]  ;;  %v450_v42 = vpack.c.bf16 %v370_v35, %v362_v34 }
  0xd2   : > { %v452_v43 = vpack.c.bf16 %v372_v37, %v364_v36 }
  0xd3   : > { %1509 = vmatmul.mubr.bf16.vlgmr.msra.gmra.mxu0 %v410_v46  ;;  %v378_v46 = vld [vmem:[%s2878_s17 + $0x320] sm:$0xff] }
  0xd4   : > { %1622 = vmatmul.mubr.bf16.vlgmr.msra.gmra.mxu1 %v412_v47  ;;  %1518 = vmatprep.mubr.bf16.mxu0 %v419_v48  ;;  %v386_v47 = vld [vmem:[%s2878_s17 + $0x360] sm:$0xff]  ;;  %v380_v48 = vld [vmem:[%s2878_s17 + $0x330] sm:$0xff] }
  0xd5   : > { %1631 = vmatprep.mubr.bf16.mxu1 %v421_v49  ;;  %v388_v49 = vld [vmem:[%s2878_s17 + $0x370] sm:$0xff]  ;;  %v458_v54 = vpack.c.bf16 %v386_v47, %v378_v46 }
  0xd6   : > { %v460_v55 = vpack.c.bf16 %v388_v49, %v380_v48 }
  0xdb   : > { %1519 = vmatmul.mubr.bf16.gmra.mxu0 %v418_v58  ;;  %v2587_v58 = vld [vmem:[#allocation6 + $0x78] sm:$0xff]  }
  0xdc   : > { %1632 = vmatmul.mubr.bf16.gmra.mxu1 %v420_v59  ;;  %1528 = vmatprep.mubr.bf16.mxu0 %v427_v60  ;;  %v2588_v59 = vld [vmem:[#allocation6 + $0x38] sm:$0xff]   ;;  %v394_v60 = vld [vmem:[%s2878_s17 + $0x3a0] sm:$0xff] }
  0xdd   : > { %1641 = vmatprep.mubr.bf16.mxu1 %v429_v61  ;;  %v402_v61 = vld [vmem:[%s2878_s17 + $0x3e0] sm:$0xff]  ;;  %2250 = vmatprep.subr.bf16.mxu0 %v2587_v58 }
  0xde   : > { %2314 = vmatprep.subr.bf16.mxu1 %v2587_v58  ;;  %2251 = vmatpush3.bf16.msra.mxu0 %v2588_v59  ;;  %v466_v2 = vpack.c.bf16 %v402_v61, %v394_v60 }
  0xdf   : > { %2322 = vmatpush3.bf16.msra.mxu1 %v2588_v59  ;;  %2252 = vmatprep.subr.bf16.mxu0 %v2589_v0 }
  0xe0   : > { %2315 = vmatprep.subr.bf16.mxu1 %v2589_v0 }
  0xe2   : > { %2253 = vmatpush3.bf16.msra.mxu0 %v2590_v1 }
  0xe3   : > { %1529 = vmatmul.mubr.bf16.gmra.mxu0 %v426_v6  ;;  %2323 = vmatpush3.bf16.msra.mxu1 %v2590_v1  ;;  %v2593_v6 = vld [vmem:[#allocation6 + $0x60] sm:$0xff]  }
  0xe4   : > { %1642 = vmatmul.mubr.bf16.gmra.mxu1 %v428_v7  ;;  %1538 = vmatprep.mubr.bf16.mxu0 %v435_v8  ;;  %v2594_v7 = vld [vmem:[#allocation6 + $0x20] sm:$0xff]   ;;  %v2595_v8 = vld [vmem:[#allocation6 + $0x58] sm:$0xff]  }
  0xe5   : > { %1651 = vmatprep.mubr.bf16.mxu1 %v437_v9  ;;  %2254 = vmatprep.subr.bf16.mxu0 %v2591_v4  ;;  %v2596_v9 = vld [vmem:[#allocation6 + $0x18] sm:$0xff]  }
  0xe6   : > { %2316 = vmatprep.subr.bf16.mxu1 %v2591_v4  ;;  %2255 = vmatpush3.bf16.msra.mxu0 %v2592_v5 }
  0xe7   : > { %2324 = vmatpush3.bf16.msra.mxu1 %v2592_v5  ;;  %2256 = vmatprep.subr.bf16.mxu0 %v2593_v6 }
  0xe8   : > { %2317 = vmatprep.subr.bf16.mxu1 %v2593_v6 }
  0xea   : > { %2257 = vmatpush3.bf16.msra.mxu0 %v2594_v7 }
  0xeb   : > { %1539 = vmatmul.mubr.bf16.gmra.mxu0 %v434_v18  ;;  %2325 = vmatpush3.bf16.msra.mxu1 %v2594_v7  ;;  %v602_v18 = vsub.s32 0, %v601_v17 }
  0xec   : > { %1652 = vmatmul.mubr.bf16.gmra.mxu1 %v436_v19  ;;  %1548 = vmatprep.mubr.bf16.mxu0 %v443_v20  ;;  %v598_v19 = vld [vmem:[%s3274_s2] sm:$0x3]  ;;  %v606_v20 = vsub.s32 1, %v601_v17 }
  0xed   : > { %1661 = vmatprep.mubr.bf16.mxu1 %v445_v21  ;;  %2258 = vmatprep.subr.bf16.mxu0 %v2595_v8  ;;  %v3019_v21 = vrot.slane %v598_v19, %v602_v18 }
  0xee   : > { %2318 = vmatprep.subr.bf16.mxu1 %v2595_v8  ;;  %2259 = vmatpush3.bf16.msra.mxu0 %v2596_v9  ;;  %v3021_v22 = vrot.slane %v598_v19, %v606_v20 }
  0xef   : > { %2326 = vmatpush3.bf16.msra.mxu1 %v2596_v9  ;;  %2260 = vmatprep.subr.bf16.mxu0 %v2597_v10 }
  0xf0   : > { %2319 = vmatprep.subr.bf16.mxu1 %v2597_v10 }
  0xf2   : > { %2261 = vmatpush3.bf16.msra.mxu0 %v2598_v11 }
  0xf3   : > { %1549 = vmatmul.mubr.bf16.gmra.mxu0 %v442_v30  ;;  %2327 = vmatpush3.bf16.msra.mxu1 %v2598_v11 }
  0xf4   : > { %1662 = vmatmul.mubr.bf16.gmra.mxu1 %v444_v31  ;;  %1558 = vmatprep.mubr.bf16.mxu0 %v451_v32 }
  0xf5   : > { %1671 = vmatprep.mubr.bf16.mxu1 %v453_v33  ;;  %2262 = vmatprep.subr.bf16.mxu0 %v2599_v12 }
  0xf6   : > { %2320 = vmatprep.subr.bf16.mxu1 %v2599_v12  ;;  %2263 = vmatpush3.bf16.msra.mxu0 %v2600_v13 }
  0xf7   : > { %2328 = vmatpush3.bf16.msra.mxu1 %v2600_v13  ;;  %2264 = vmatprep.subr.bf16.mxu0 %v2601_v14 }
  0xf8   : > { %2321 = vmatprep.subr.bf16.mxu1 %v2601_v14 }
  0xfa   : > { %2265 = vmatpush3.bf16.msra.mxu0 %v2602_v15 }
  0xfb   : > { %1559 = vmatmul.mubr.bf16.gmra.mxu0 %v450_v42  ;;  %2329 = vmatpush3.bf16.msra.mxu1 %v2602_v15 }
  0xfc   : > { %1672 = vmatmul.mubr.bf16.gmra.mxu1 %v452_v43  ;;  %1568 = vmatprep.mubr.bf16.mxu0 %v459_v44 }
  0xfd   : > { %1681 = vmatprep.mubr.bf16.mxu1 %v461_v45 }
 0x103   : > { %1569 = vmatmul.mubr.bf16.gmra.mxu0 %v458_v54 }
 0x104   : > { %1682 = vmatmul.mubr.bf16.gmra.mxu1 %v460_v55  ;;  %1578 = vmatprep.mubr.bf16.mxu0 %v467_v56 }
 0x105   : > { %1691 = vmatprep.mubr.bf16.mxu1 %v469_v57 }
 0x10b   : > { %1579 = vmatmul.mubr.bf16.gmra.mxu0 %v466_v2 }
 0x10c   : > { %1692 = vmatmul.mubr.bf16.gmra.mxu1 %v468_v3 }
 0x153   : > { %v1284_v23 = vpop.f32.mrf.mxu0 }
 0x154   : > { %v1397_v24 = vpop.f32.mrf.mxu1  ;;  %v1285_v25 = vadd.f32 %v1284_v23, %v3019_v21 }
 0x155   : > { %v1286_v26 = vpop.f32.mrf.mxu0 }
 0x156   : > { %v1399_v27 = vpop.f32.mrf.mxu1  ;;  %v3024_v28 = vadd.f32 %v1397_v24, %v1285_v25  ;;  %v1287_v29 = vadd.f32 %v1286_v26, %v3021_v22 }
 0x157   : > { %v3027_v30 = vpop.f32.mrf.mxu0 }
 0x158   : > { %v3029_v31 = vpop.f32.mrf.mxu1  ;;  %v3031_v32 = vadd.f32 %v1399_v27, %v1287_v29 }
 0x159   : > { %v3033_v33 = vpop.f32.mrf.mxu0 }
 0x15a   : > { %v3035_v34 = vpop.f32.mrf.mxu1 }
 0x15b   : > { %v1294_v35 = vpop.f32.mrf.mxu0 }
 0x15c   : > { %v1407_v36 = vpop.f32.mrf.mxu1  ;;  %v1295_v37 = vadd.f32 %v1294_v35, %v3019_v21 }
 0x15d   : > { %v1296_v38 = vpop.f32.mrf.mxu0 }
 0x15e   : > { %v1409_v39 = vpop.f32.mrf.mxu1  ;;  %v3038_v40 = vadd.f32 %v1407_v36, %v1295_v37  ;;  %v1297_v41 = vadd.f32 %v1296_v38, %v3021_v22 }
 0x15f   : > { %v3041_v42 = vpop.f32.mrf.mxu0 }
 0x160   : > { %v3043_v43 = vpop.f32.mrf.mxu1  ;;  %v3045_v44 = vadd.f32 %v1409_v39, %v1297_v41 }
 0x161   : > { %v3047_v45 = vpop.f32.mrf.mxu0 }
 0x162   : > { %v3049_v46 = vpop.f32.mrf.mxu1 }
 0x163   : > { %v1304_v47 = vpop.f32.mrf.mxu0 }
 0x164   : > { %v1417_v48 = vpop.f32.mrf.mxu1  ;;  %v1305_v49 = vadd.f32 %v1304_v47, %v3019_v21 }
 0x165   : > { %v1306_v50 = vpop.f32.mrf.mxu0 }
 0x166   : > { %v1419_v51 = vpop.f32.mrf.mxu1  ;;  %v3052_v52 = vadd.f32 %v1417_v48, %v1305_v49  ;;  %v1307_v53 = vadd.f32 %v1306_v50, %v3021_v22 }
 0x167   : > { %v3055_v54 = vpop.f32.mrf.mxu0 }
 0x168   : > { %v3057_v55 = vpop.f32.mrf.mxu1  ;;  %v3059_v56 = vadd.f32 %v1419_v51, %v1307_v53 }
 0x169   : > { %v3061_v57 = vpop.f32.mrf.mxu0 }
 0x16a   : > { %v3063_v58 = vpop.f32.mrf.mxu1 }
 0x16b   : > { %v1314_v59 = vpop.f32.mrf.mxu0 }
 0x16c   : > { %v1427_v60 = vpop.f32.mrf.mxu1  ;;  %v1315_v61 = vadd.f32 %v1314_v59, %v3019_v21 }
 0x16d   : > { %v1316_v62 = vpop.f32.mrf.mxu0 }
 0x16e   : > { %v1429_v63 = vpop.f32.mrf.mxu1  ;;  %v3066_v0 = vadd.f32 %v1427_v60, %v1315_v61  ;;  %v1317_v1 = vadd.f32 %v1316_v62, %v3021_v22 }
 0x16f   : > { %v3069_v2 = vpop.f32.mrf.mxu0 }
 0x170   : > { %v3071_v3 = vpop.f32.mrf.mxu1  ;;  %v3073_v4 = vadd.f32 %v1429_v63, %v1317_v1 }
 0x171   : > { %v3075_v5 = vpop.f32.mrf.mxu0 }
 0x172   : > { %v3077_v6 = vpop.f32.mrf.mxu1 }
 0x173   : > { %v1324_v7 = vpop.f32.mrf.mxu0 }
 0x174   : > { %v1437_v8 = vpop.f32.mrf.mxu1  ;;  %v1325_v9 = vadd.f32 %v1324_v7, %v3019_v21 }
 0x175   : > { %v1326_v10 = vpop.f32.mrf.mxu0 }
 0x176   : > { %v1439_v11 = vpop.f32.mrf.mxu1  ;;  %v3080_v12 = vadd.f32 %v1437_v8, %v1325_v9  ;;  %v1327_v13 = vadd.f32 %v1326_v10, %v3021_v22 }
 0x177   : > { %v3083_v14 = vpop.f32.mrf.mxu0 }
 0x178   : > { %v3085_v15 = vpop.f32.mrf.mxu1  ;;  %v3087_v16 = vadd.f32 %v1439_v11, %v1327_v13 }
 0x179   : > { %v3089_v17 = vpop.f32.mrf.mxu0 }
 0x17a   : > { %v3091_v18 = vpop.f32.mrf.mxu1 }
 0x17b   : > { %v1334_v19 = vpop.f32.mrf.mxu0 }
 0x17c   : > { %v1447_v20 = vpop.f32.mrf.mxu1  ;;  %v1335_v23 = vadd.f32 %v1334_v19, %v3019_v21 }
 0x17d   : > { %v1336_v24 = vpop.f32.mrf.mxu0 }
 0x17e   : > { %v1449_v25 = vpop.f32.mrf.mxu1  ;;  %v3094_v26 = vadd.f32 %v1447_v20, %v1335_v23  ;;  %v1337_v27 = vadd.f32 %v1336_v24, %v3021_v22 }
 0x17f   : > { %v3097_v29 = vpop.f32.mrf.mxu0 }
 0x180   : > { %v3099_v35 = vpop.f32.mrf.mxu1  ;;  %v3101_v36 = vadd.f32 %v1449_v25, %v1337_v27  ;;  %v1289_v25 = vadd.f32 %v3027_v30, %v3019_v21 }
 0x181   : > { %v3103_v37 = vpop.f32.mrf.mxu0 }
 0x182   : > { %v3105_v38 = vpop.f32.mrf.mxu1 }
 0x183   : > { %v1344_v39 = vpop.f32.mrf.mxu0 }
 0x184   : > { %v1457_v41 = vpop.f32.mrf.mxu1  ;;  %v1345_v47 = vadd.f32 %v1344_v39, %v3019_v21 }
 0x185   : > { %v1346_v48 = vpop.f32.mrf.mxu0 }
 0x186   : > { %v1459_v49 = vpop.f32.mrf.mxu1  ;;  %v3108_v50 = vadd.f32 %v1457_v41, %v1345_v47  ;;  %v1347_v51 = vadd.f32 %v1346_v48, %v3021_v22  ;;  %v1291_v41 = vadd.f32 %v3033_v33, %v3021_v22 }
 0x187   : > { %v3111_v53 = vpop.f32.mrf.mxu0 }
 0x188   : > { %v3113_v59 = vpop.f32.mrf.mxu1  ;;  %v3115_v60 = vadd.f32 %v1459_v49, %v1347_v51  ;;  %v1402_v49 = vadd.f32 %v3029_v31, %v1289_v25 }
 0x189   : > { %v3117_v61 = vpop.f32.mrf.mxu0 }
 0x18a   : > { %v3119_v62 = vpop.f32.mrf.mxu1 }
 0x18b   : > { %v1354_v63 = vpop.f32.mrf.mxu0 }
 0x18c   : > { %v1467_v1 = vpop.f32.mrf.mxu1  ;;  %v1355_v7 = vadd.f32 %v1354_v63, %v3019_v21 }
 0x18d   : > { %v1356_v8 = vpop.f32.mrf.mxu0 }
 0x18e   : > { %v1469_v9 = vpop.f32.mrf.mxu1  ;;  %v3122_v10 = vadd.f32 %v1467_v1, %v1355_v7  ;;  %v1357_v11 = vadd.f32 %v1356_v8, %v3021_v22  ;;  %v1404_v8 = vadd.f32 %v3035_v34, %v1291_v41 }
 0x18f   : > { %v3125_v13 = vpop.f32.mrf.mxu0 }
 0x190   : > { %3290 = vst [vmem:[#allocation9_spill] sm:$0xff] %v3122_v10  ;;  %v3127_v19 = vpop.f32.mrf.mxu1  ;;  %v3129_v20 = vadd.f32 %v1469_v9, %v1357_v11 }
 0x191   : > { %3291 = vst [vmem:[#allocation10_spill] sm:$0xff] %v3127_v19  ;;  %v3131_v23 = vpop.f32.mrf.mxu0 }
 0x192   : > { %3292 = vst [vmem:[#allocation11_spill] sm:$0xff] %v3129_v20  ;;  %3293 = vst [vmem:[#allocation12_spill] sm:$0xff] %v3131_v23  ;;  %v3133_v24 = vpop.f32.mrf.mxu1 }
 0x193   : > { %3294 = vst [vmem:[#allocation13_spill] sm:$0xff] %v3133_v24  ;;  %v1510_v27 = vpop.f32.mrf.mxu0  ;;  %v1299_v24 = vadd.f32 %v3041_v42, %v3019_v21 }
 0x194   : > { %v1623_v39 = vpop.f32.mrf.mxu1  ;;  %v1511_v63 = vadd.f32 %v1510_v27, %v3024_v28 }
 0x195   : > { %v1512_v47 = vpop.f32.mrf.mxu0  ;;  %v1412_v34 = vadd.f32 %v3043_v43, %v1299_v24 }
 0x196   : > { %v1625_v48 = vpop.f32.mrf.mxu1  ;;  %v1513_v51 = vadd.f32 %v1512_v47, %v3031_v32  ;;  %v1624_v19 = vadd.f32 %v1623_v39, %v1511_v63  ;;  %v1301_v32 = vadd.f32 %v3047_v45, %v3021_v22 }
 0x197   : > { %v1514_v1 = vpop.f32.mrf.mxu0 }
 0x198   : > { %v1627_v7 = vpop.f32.mrf.mxu1  ;;  %v1515_v9 = vadd.f32 %v1514_v1, %v1402_v49  ;;  %v1626_v10 = vadd.f32 %v1625_v48, %v1513_v51  ;;  %v1702_v42 = vmax.f32 %v1624_v19, 0.0  ;;  %v1414_v63 = vadd.f32 %v3049_v46, %v1301_v32 }
 0x199   : > { %v1516_v11 = vpop.f32.mrf.mxu0 }
 0x19a   : > { %v1629_v30 = vpop.f32.mrf.mxu1  ;;  %v1628_v33 = vadd.f32 %v1627_v7, %v1515_v9  ;;  %v1517_v20 = vadd.f32 %v1516_v11, %v1404_v8  ;;  %v1703_v41 = vmax.f32 %v1626_v10, 0.0  ;;  %v1309_v11 = vadd.f32 %v3055_v54, %v3019_v21 }
 0x19b   : > { %v1520_v23 = vpop.f32.mrf.mxu0 }
 0x19c   : > { %v1633_v31 = vpop.f32.mrf.mxu1  ;;  %v1630_v28 = vadd.f32 %v1629_v30, %v1517_v20  ;;  %v1704_v25 = vmax.f32 %v1628_v33, 0.0  ;;  %v1521_v48 = vadd.f32 %v1520_v23, %v3038_v40  ;;  %v1311_v40 = vadd.f32 %v3061_v57, %v3021_v22 }
 0x19d   : > { %v1522_v27 = vpop.f32.mrf.mxu0 }
 0x19e   : > { %v1635_v47 = vpop.f32.mrf.mxu1  ;;  %v1705_v49 = vmax.f32 %v1630_v28, 0.0  ;;  %v1523_v1 = vadd.f32 %v1522_v27, %v3045_v44  ;;  %v1734_v45 = vpack.c.bf16 %v1704_v25, %v1702_v42  ;;  %v1634_v44 = vadd.f32 %v1633_v31, %v1521_v48 }
 0x19f   : > { %v1524_v51 = vpop.f32.mrf.mxu0  ;;  %v1422_v28 = vadd.f32 %v3057_v55, %v1309_v11 }
 0x1a0   : > { %v1637_v39 = vpop.f32.mrf.mxu1  ;;  %v1735_v7 = vpack.c.bf16 %v1705_v49, %v1703_v41  ;;  %v1525_v8 = vadd.f32 %v1524_v51, %v1412_v34  ;;  %v1636_v43 = vadd.f32 %v1635_v47, %v1523_v1  ;;  %v1706_v47 = vmax.f32 %v1634_v44, 0.0 }
 0x1a1   : > { %v1526_v20 = vpop.f32.mrf.mxu0  ;;  %v1424_v49 = vadd.f32 %v3063_v58, %v1311_v40 }
 0x1a2   : > { %v1639_v9 = vpop.f32.mrf.mxu1  ;;  %v1638_v10 = vadd.f32 %v1637_v39, %v1525_v8  ;;  %v1527_v24 = vadd.f32 %v1526_v20, %v1414_v63  ;;  %1917 = vmatprep.mubr.bf16.mxu0 %v1735_v7  ;;  %v1707_v25 = vmax.f32 %v1636_v43, 0.0  ;;  %v1319_v39 = vadd.f32 %v3069_v2, %v3019_v21 }
 0x1a3   : > { %v1530_v19 = vpop.f32.mrf.mxu0  ;;  %1918 = vmatmul.mubr.bf16.vlgmr.msra.gmra.mxu0 %v1734_v45 }
 0x1a4   : > { %v1643_v30 = vpop.f32.mrf.mxu1  ;;  %v1640_v46 = vadd.f32 %v1639_v9, %v1527_v24  ;;  %v1708_v23 = vmax.f32 %v1638_v10, 0.0  ;;  %v1531_v34 = vadd.f32 %v1530_v19, %v3052_v52  ;;  %v1321_v52 = vadd.f32 %v3075_v5, %v3021_v22 }
 0x1a5   : > { %v1532_v33 = vpop.f32.mrf.mxu0  ;;  %v1432_v43 = vadd.f32 %v3071_v3, %v1319_v39 }
 0x1a6   : > { %v1645_v32 = vpop.f32.mrf.mxu1  ;;  %v1709_v27 = vmax.f32 %v1640_v46, 0.0  ;;  %v1533_v54 = vadd.f32 %v1532_v33, %v3059_v56  ;;  %v1736_v57 = vpack.c.bf16 %v1708_v23, %v1706_v47  ;;  %v1644_v56 = vadd.f32 %v1643_v30, %v1531_v34 }
 0x1a7   : > { %v1534_v31 = vpop.f32.mrf.mxu0  ;;  %v1434_v46 = vadd.f32 %v3077_v6, %v1321_v52  ;;  %v1339_v52 = vadd.f32 %v3097_v29, %v3019_v21 }
 0x1a8   : > { %v1647_v41 = vpop.f32.mrf.mxu1  ;;  %v1737_v1 = vpack.c.bf16 %v1709_v27, %v1707_v25  ;;  %v1535_v42 = vadd.f32 %v1534_v31, %v1422_v28  ;;  %v1646_v55 = vadd.f32 %v1645_v32, %v1533_v54  ;;  %v1710_v44 = vmax.f32 %v1644_v56, 0.0 }
 0x1a9   : > { %v1536_v48 = vpop.f32.mrf.mxu0  ;;  %v1329_v25 = vadd.f32 %v3083_v14, %v3019_v21 }
 0x1aa   : > { %v1649_v51 = vpop.f32.mrf.mxu1  ;;  %v1648_v63 = vadd.f32 %v1647_v41, %v1535_v42  ;;  %v1537_v7 = vadd.f32 %v1536_v48, %v1424_v49  ;;  %1925 = vmatprep.mubr.bf16.mxu0 %v1737_v1  ;;  %v1711_v10 = vmax.f32 %v1646_v55, 0.0 }
 0x1ab   : > { %v1540_v8 = vpop.f32.mrf.mxu0  ;;  %1926 = vmatmul.mubr.bf16.gmra.mxu0 %v1736_v57  ;;  %v1442_v1 = vadd.f32 %v3085_v15, %v1329_v25 }
 0x1ac   : > { %v1653_v45 = vpop.f32.mrf.mxu1  ;;  %v1650_v58 = vadd.f32 %v1649_v51, %v1537_v7  ;;  %v1712_v20 = vmax.f32 %v1648_v63, 0.0  ;;  %v1541_v19 = vadd.f32 %v1540_v8, %v3066_v0  ;;  %v1331_v0 = vadd.f32 %v3089_v17, %v3021_v22 }
 0x1ad   : > { %v1542_v9 = vpop.f32.mrf.mxu0 }
 0x1ae   : > { %v1655_v11 = vpop.f32.mrf.mxu1  ;;  %v1713_v24 = vmax.f32 %v1650_v58, 0.0  ;;  %v1543_v2 = vadd.f32 %v1542_v9, %v3073_v4  ;;  %v1738_v5 = vpack.c.bf16 %v1712_v20, %v1710_v44  ;;  %v1654_v4 = vadd.f32 %v1653_v45, %v1541_v19 }
 0x1af   : > { %v1544_v30 = vpop.f32.mrf.mxu0  ;;  %v1444_v63 = vadd.f32 %v3091_v18, %v1331_v0 }
 0x1b0   : > { %v1657_v40 = vpop.f32.mrf.mxu1  ;;  %v1739_v23 = vpack.c.bf16 %v1713_v24, %v1711_v10  ;;  %v1545_v33 = vadd.f32 %v1544_v30, %v1432_v43  ;;  %v1656_v3 = vadd.f32 %v1655_v11, %v1543_v2  ;;  %v1714_v48 = vmax.f32 %v1654_v4, 0.0 }
 0x1b1   : > { %v1546_v32 = vpop.f32.mrf.mxu0  ;;  %v1452_v2 = vadd.f32 %v3099_v35, %v1339_v52 }
 0x1b2   : > { %v1659_v28 = vpop.f32.mrf.mxu1  ;;  %v1658_v27 = vadd.f32 %v1657_v40, %v1545_v33  ;;  %v1547_v54 = vadd.f32 %v1546_v32, %v1434_v46  ;;  %1933 = vmatprep.mubr.bf16.mxu0 %v1739_v23  ;;  %v1715_v42 = vmax.f32 %v1656_v3, 0.0  ;;  %v1349_v3 = vadd.f32 %v3111_v53, %v3019_v21 }
 0x1b3   : > { %v1550_v47 = vpop.f32.mrf.mxu0  ;;  %1934 = vmatmul.mubr.bf16.gmra.mxu0 %v1738_v5 }
 0x1b4   : > { %v1663_v34 = vpop.f32.mrf.mxu1  ;;  %v1660_v6 = vadd.f32 %v1659_v28, %v1547_v54  ;;  %v1716_v31 = vmax.f32 %v1658_v27, 0.0  ;;  %v1551_v51 = vadd.f32 %v1550_v47, %v3080_v12  ;;  %v1341_v12 = vadd.f32 %v3103_v37, %v3021_v22 }
 0x1b5   : > { %v1552_v41 = vpop.f32.mrf.mxu0 }
 0x1b6   : > { %v1665_v49 = vpop.f32.mrf.mxu1  ;;  %v1717_v57 = vmax.f32 %v1660_v6, 0.0  ;;  %v1553_v14 = vadd.f32 %v1552_v41, %v3087_v16  ;;  %v1740_v17 = vpack.c.bf16 %v1716_v31, %v1714_v48  ;;  %v1664_v16 = vadd.f32 %v1663_v34, %v1551_v51 }
 0x1b7   : > { %v1554_v39 = vpop.f32.mrf.mxu0  ;;  %v1454_v33 = vadd.f32 %v3105_v38, %v1341_v12  ;;  %v1462_v31 = vadd.f32 %v3113_v59, %v1349_v3 }
 0x1b8   : > { %v1667_v55 = vpop.f32.mrf.mxu1  ;;  %v1741_v7 = vpack.c.bf16 %v1717_v57, %v1715_v42  ;;  %v1555_v56 = vadd.f32 %v1554_v39, %v1442_v1  ;;  %v1666_v15 = vadd.f32 %v1665_v49, %v1553_v14  ;;  %v1718_v30 = vmax.f32 %v1664_v16, 0.0  ;;  %v3296_v16 = vld [vmem:[#allocation10_spill] sm:$0xff] }
 0x1b9   : > { %v1556_v8 = vpop.f32.mrf.mxu0 }
 0x1ba   : > { %v1669_v45 = vpop.f32.mrf.mxu1  ;;  %v1668_v58 = vadd.f32 %v1667_v55, %v1555_v56  ;;  %v1557_v20 = vadd.f32 %v1556_v8, %v1444_v63  ;;  %1941 = vmatprep.mubr.bf16.mxu0 %v1741_v7  ;;  %v1719_v44 = vmax.f32 %v1666_v15, 0.0  ;;  %v1359_v7 = vadd.f32 %v3125_v13, %v3019_v21  ;;  %v3297_v21 = vld [vmem:[#allocation11_spill] sm:$0xff] }
 0x1bb   : > { %v1560_v9 = vpop.f32.mrf.mxu0  ;;  %1942 = vmatmul.mubr.bf16.gmra.mxu0 %v1740_v17 }
 0x1bc   : > { %v1673_v11 = vpop.f32.mrf.mxu1  ;;  %v1670_v18 = vadd.f32 %v1669_v45, %v1557_v20  ;;  %v1720_v43 = vmax.f32 %v1668_v58, 0.0  ;;  %v1561_v40 = vadd.f32 %v1560_v9, %v3094_v26  ;;  %v1351_v26 = vadd.f32 %v3117_v61, %v3021_v22 }
 0x1bd   : > { %v1562_v10 = vpop.f32.mrf.mxu0  ;;  %v1472_v9 = vadd.f32 %v3296_v16, %v1359_v7 }
 0x1be   : > { %v1675_v24 = vpop.f32.mrf.mxu1  ;;  %v1721_v19 = vmax.f32 %v1670_v18, 0.0  ;;  %v1563_v29 = vadd.f32 %v1562_v10, %v3101_v36  ;;  %v1742_v37 = vpack.c.bf16 %v1720_v43, %v1718_v30  ;;  %v1674_v36 = vadd.f32 %v1673_v11, %v1561_v40  ;;  %v3298_v43 = vld [vmem:[#allocation9_spill] sm:$0xff] }
 0x1bf   : > { %v1564_v46 = vpop.f32.mrf.mxu0  ;;  %v1464_v48 = vadd.f32 %v3119_v62, %v1351_v26 }
 0x1c0   : > { %v1677_v23 = vpop.f32.mrf.mxu1  ;;  %v1743_v5 = vpack.c.bf16 %v1721_v19, %v1719_v44  ;;  %v1565_v32 = vadd.f32 %v1564_v46, %v1452_v2  ;;  %v1676_v35 = vadd.f32 %v1675_v24, %v1563_v29  ;;  %v1722_v1 = vmax.f32 %v1674_v36, 0.0  ;;  %v3299_v44 = vld [vmem:[#allocation13_spill] sm:$0xff] }
 0x1c1   : > { %v1566_v28 = vpop.f32.mrf.mxu0 }
 0x1c2   : > { %v1679_v25 = vpop.f32.mrf.mxu1  ;;  %v1678_v27 = vadd.f32 %v1677_v23, %v1565_v32  ;;  %v1567_v54 = vadd.f32 %v1566_v28, %v1454_v33  ;;  %1949 = vmatprep.mubr.bf16.mxu1 %v1743_v5  ;;  %v1723_v41 = vmax.f32 %v1676_v35, 0.0 }
 0x1c3   : > { %v1570_v4 = vpop.f32.mrf.mxu0  ;;  %1950 = vmatmul.mubr.bf16.vlgmr.msra.gmra.mxu1 %v1742_v37 }
 0x1c4   : > { %v1683_v47 = vpop.f32.mrf.mxu1  ;;  %v1680_v38 = vadd.f32 %v1679_v25, %v1567_v54  ;;  %v1724_v34 = vmax.f32 %v1678_v27, 0.0  ;;  %v1571_v42 = vadd.f32 %v1570_v4, %v3108_v50  ;;  %v3295_v50 = vld [vmem:[#allocation12_spill] sm:$0xff]  ;;  %v3204_v4 = vld [vmem:[%s3276_s4] ss:$0 sm:$0xff] }
 0x1c5   : > { %v1572_v0 = vpop.f32.mrf.mxu0  ;;  %v1361_v52 = vadd.f32 %v3295_v50, %v3021_v22 }
 0x1c6   : > { %v1685_v6 = vpop.f32.mrf.mxu1  ;;  %v1725_v49 = vmax.f32 %v1680_v38, 0.0  ;;  %v1573_v53 = vadd.f32 %v1572_v0, %v3115_v60  ;;  %v1744_v61 = vpack.c.bf16 %v1724_v34, %v1722_v1  ;;  %v1684_v60 = vadd.f32 %v1683_v47, %v1571_v42 }
 0x1c7   : > { %v1574_v57 = vpop.f32.mrf.mxu0  ;;  %v1474_v19 = vadd.f32 %v3299_v44, %v1361_v52 }
 0x1c8   : > { %v1687_v14 = vpop.f32.mrf.mxu1  ;;  %v1745_v51 = vpack.c.bf16 %v1725_v49, %v1723_v41  ;;  %v1575_v39 = vadd.f32 %v1574_v57, %v1462_v31  ;;  %v1686_v59 = vadd.f32 %v1685_v6, %v1573_v53  ;;  %v1726_v18 = vmax.f32 %v1684_v60, 0.0 }
 0x1c9   : > { %v1576_v55 = vpop.f32.mrf.mxu0 }
 0x1ca   : > { %v1689_v63 = vpop.f32.mrf.mxu1  ;;  %v1688_v56 = vadd.f32 %v1687_v14, %v1575_v39  ;;  %v1577_v17 = vadd.f32 %v1576_v55, %v1464_v48  ;;  %1957 = vmatprep.mubr.bf16.mxu1 %v1745_v51  ;;  %v1727_v11 = vmax.f32 %v1686_v59, 0.0 }
 0x1cb   : > { %v1580_v8 = vpop.f32.mrf.mxu0  ;;  %1958 = vmatmul.mubr.bf16.gmra.mxu1 %v1744_v61 }
 0x1cc   : > { %v1693_v45 = vpop.f32.mrf.mxu1  ;;  %v1690_v62 = vadd.f32 %v1689_v63, %v1577_v17  ;;  %v1728_v15 = vmax.f32 %v1688_v56, 0.0  ;;  %v1581_v10 = vadd.f32 %v1580_v8, %v3298_v43 }
 0x1cd   : > { %v1582_v58 = vpop.f32.mrf.mxu0 }
 0x1ce   : > { %v1695_v20 = vpop.f32.mrf.mxu1  ;;  %v1729_v12 = vmax.f32 %v1690_v62, 0.0  ;;  %v1583_v13 = vadd.f32 %v1582_v58, %v3297_v21  ;;  %v1746_v22 = vpack.c.bf16 %v1728_v15, %v1726_v18  ;;  %v1694_v5 = vadd.f32 %v1693_v45, %v1581_v10 }
 0x1cf   : > { %v1584_v24 = vpop.f32.mrf.mxu0 }
 0x1d0   : > { %v1697_v2 = vpop.f32.mrf.mxu1  ;;  %v1747_v29 = vpack.c.bf16 %v1729_v12, %v1727_v11  ;;  %v1585_v30 = vadd.f32 %v1584_v24, %v1472_v9  ;;  %v1696_v46 = vadd.f32 %v1695_v20, %v1583_v13  ;;  %v1730_v35 = vmax.f32 %v1694_v5, 0.0 }
 0x1d1   : > { %v1586_v40 = vpop.f32.mrf.mxu0 }
 0x1d2   : > { %v1698_v23 = vadd.f32 %v1697_v2, %v1585_v30  ;;  %v1587_v33 = vadd.f32 %v1586_v40, %v1474_v19  ;;  %1965 = vmatprep.mubr.bf16.mxu1 %v1747_v29  ;;  %v1699_v32 = vpop.f32.mrf.mxu1  ;;  %v1731_v25 = vmax.f32 %v1696_v46, 0.0 }
 0x1d3   : > { %1966 = vmatmul.mubr.bf16.gmra.mxu1 %v1746_v22 }
 0x1d4   : > { %v1700_v37 = vadd.f32 %v1699_v32, %v1587_v33  ;;  %v1732_v28 = vmax.f32 %v1698_v23, 0.0 }
 0x1d6   : > { %v1733_v3 = vmax.f32 %v1700_v37, 0.0  ;;  %v1748_v54 = vpack.c.bf16 %v1732_v28, %v1730_v35 }
 0x1d8   : > { %v1749_v27 = vpack.c.bf16 %v1733_v3, %v1731_v25 }
 0x1da   : > { %1973 = vmatprep.mubr.bf16.mxu1 %v1749_v27 }
 0x1db   : > { %1974 = vmatmul.mubr.bf16.gmra.mxu1 %v1748_v54 }
 0x263   : > { %v2266_v36 = vpop.f32.mrf.mxu0 }
 0x265   : > { %v2267_v47 = vpop.f32.mrf.mxu0 }
 0x266   : > { %v2268_v26 = vadd.f32 %v2267_v47, %v2266_v36 }
 0x267   : > { %v2269_v38 = vpop.f32.mrf.mxu0 }
 0x268   : > { %v1920_v34 = vadd.f32 %v2268_v26, %v3204_v4 }
 0x269   : > { %v2270_v0 = vpop.f32.mrf.mxu0 }
 0x26a   : > { %1983 = vst.msk [vmem:[%s3209_s18] sm:$0xff] %vm1982_vm0, %v1920_v34  ;;  %v2271_v6 = vadd.f32 %v2270_v0, %v2269_v38 }
 0x26b   : > { %v2272_v31 = vpop.f32.mrf.mxu0 }
 0x26c   : > { %v1923_v41 = vadd.f32 %v2271_v6, %v3204_v4 }
 0x26d   : > { %v2273_v49 = vpop.f32.mrf.mxu0 }
 0x26e   : > { %1984 = vst.msk [vmem:[%s3209_s18 + $0x8] sm:$0xff] %vm1982_vm0, %v1923_v41  ;;  %v2274_v53 = vadd.f32 %v2273_v49, %v2272_v31 }
 0x26f   : > { %v2275_v1 = vpop.f32.mrf.mxu0 }
 0x270   : > { %v1928_v42 = vadd.f32 %v2274_v53, %v3204_v4 }
 0x271   : > { %v2276_v57 = vpop.f32.mrf.mxu0 }
 0x272   : > { %1985 = vst.msk [vmem:[%s3209_s18 + $0x10] sm:$0xff] %vm1982_vm0, %v1928_v42  ;;  %v2277_v14 = vadd.f32 %v2276_v57, %v2275_v1 }
 0x273   : > { %v2278_v48 = vpop.f32.mrf.mxu0 }
 0x274   : > { %v1931_v51 = vadd.f32 %v2277_v14, %v3204_v4 }
 0x275   : > { %v2279_v39 = vpop.f32.mrf.mxu0 }
 0x276   : > { %1986 = vst.msk [vmem:[%s3209_s18 + $0x18] sm:$0xff] %vm1982_vm0, %v1931_v51  ;;  %v2280_v61 = vadd.f32 %v2279_v39, %v2278_v48 }
 0x277   : > { %v2281_v55 = vpop.f32.mrf.mxu0 }
 0x278   : > { %v1936_v63 = vadd.f32 %v2280_v61, %v3204_v4 }
 0x279   : > { %v2282_v7 = vpop.f32.mrf.mxu0 }
 0x27a   : > { %1987 = vst.msk [vmem:[%s3209_s18 + $0x20] sm:$0xff] %vm1982_vm0, %v1936_v63  ;;  %v2283_v59 = vadd.f32 %v2282_v7, %v2281_v55 }
 0x27b   : > { %v2284_v56 = vpop.f32.mrf.mxu0 }
 0x27c   : > { %v1939_v17 = vadd.f32 %v2283_v59, %v3204_v4 }
 0x27d   : > { %v2285_v60 = vpop.f32.mrf.mxu0 }
 0x27e   : > { %1988 = vst.msk [vmem:[%s3209_s18 + $0x28] sm:$0xff] %vm1982_vm0, %v1939_v17  ;;  %v2286_v8 = vadd.f32 %v2285_v60, %v2284_v56 }
 0x27f   : > { %v2287_v45 = vpop.f32.mrf.mxu0 }
 0x280   : > { %v1944_v50 = vadd.f32 %v2286_v8, %v3204_v4 }
 0x281   : > { %v2288_v52 = vpop.f32.mrf.mxu0 }
 0x282   : > { %1989 = vst.msk [vmem:[%s3209_s18 + $0x30] sm:$0xff] %vm1982_vm0, %v1944_v50  ;;  %v2289_v62 = vadd.f32 %v2288_v52, %v2287_v45 }
 0x283   : > { %v2290_v15 = vpop.f32.mrf.mxu1 }
 0x284   : > { %v1947_v58 = vadd.f32 %v2289_v62, %v3204_v4 }
 0x285   : > { %v2291_v20 = vpop.f32.mrf.mxu1 }
 0x286   : > { %1990 = vst.msk [vmem:[%s3209_s18 + $0x38] sm:$0xff] %vm1982_vm0, %v1947_v58  ;;  %v2292_v16 = vadd.f32 %v2291_v20, %v2290_v15 }
 0x287   : > { %v2293_v9 = vpop.f32.mrf.mxu1 }
 0x288   : > { %v1952_v11 = vadd.f32 %v2292_v16, %v3204_v4 }
 0x289   : > { %v2294_v12 = vpop.f32.mrf.mxu1 }
 0x28a   : > { %1991 = vst.msk [vmem:[%s3209_s18 + $0x40] sm:$0xff] %vm1982_vm0, %v1952_v11  ;;  %v2295_v21 = vadd.f32 %v2294_v12, %v2293_v9 }
 0x28b   : > { %v2296_v13 = vpop.f32.mrf.mxu1 }
 0x28c   : > { %v1955_v18 = vadd.f32 %v2295_v21, %v3204_v4 }
 0x28d   : > { %v2297_v43 = vpop.f32.mrf.mxu1 }
 0x28e   : > { %1992 = vst.msk [vmem:[%s3209_s18 + $0x48] sm:$0xff] %vm1982_vm0, %v1955_v18  ;;  %v2298_v10 = vadd.f32 %v2297_v43, %v2296_v13 }
 0x28f   : > { %v2299_v24 = vpop.f32.mrf.mxu1 }
 0x290   : > { %v1960_v2 = vadd.f32 %v2298_v10, %v3204_v4 }
 0x291   : > { %v2300_v44 = vpop.f32.mrf.mxu1 }
 0x292   : > { %1993 = vst.msk [vmem:[%s3209_s18 + $0x50] sm:$0xff] %vm1982_vm0, %v1960_v2  ;;  %v2301_v19 = vadd.f32 %v2300_v44, %v2299_v24 }
 0x293   : > { %v2302_v29 = vpop.f32.mrf.mxu1 }
 0x294   : > { %v1963_v30 = vadd.f32 %v2301_v19, %v3204_v4 }
 0x295   : > { %v2303_v22 = vpop.f32.mrf.mxu1 }
 0x296   : > { %1994 = vst.msk [vmem:[%s3209_s18 + $0x58] sm:$0xff] %vm1982_vm0, %v1963_v30  ;;  %v2304_v40 = vadd.f32 %v2303_v22, %v2302_v29 }
 0x297   : > { %v2305_v46 = vpop.f32.mrf.mxu1 }
 0x298   : > { %v1968_v23 = vadd.f32 %v2304_v40, %v3204_v4 }
 0x299   : > { %v2306_v33 = vpop.f32.mrf.mxu1 }
 0x29a   : > { %1995 = vst.msk [vmem:[%s3209_s18 + $0x60] sm:$0xff] %vm1982_vm0, %v1968_v23  ;;  %v2307_v5 = vadd.f32 %v2306_v33, %v2305_v46 }
 0x29b   : > { %v2308_v32 = vpop.f32.mrf.mxu1 }
 0x29c   : > { %v1971_v37 = vadd.f32 %v2307_v5, %v3204_v4 }
 0x29d   : > { %v2309_v28 = vpop.f32.mrf.mxu1 }
 0x29e   : > { %1996 = vst.msk [vmem:[%s3209_s18 + $0x68] sm:$0xff] %vm1982_vm0, %v1971_v37  ;;  %v2310_v25 = vadd.f32 %v2309_v28, %v2308_v32 }
 0x29f   : > { %v2311_v3 = vpop.f32.mrf.mxu1 }
 0x2a0   : > { %v1976_v35 = vadd.f32 %v2310_v25, %v3204_v4 }
 0x2a1   : > { %v2312_v27 = vpop.f32.mrf.mxu1 }
 0x2a2   : > { %1997 = vst.msk [vmem:[%s3209_s18 + $0x70] sm:$0xff] %vm1982_vm0, %v1976_v35  ;;  %v2313_v54 = vadd.f32 %v2312_v27, %v2311_v3 }
 0x2a4   : > { %v1979_v36 = vadd.f32 %v2313_v54, %v3204_v4 }
 0x2a6   : > { %1998 = vst.msk [vmem:[%s3209_s18 + $0x78] sm:$0xff] %vm1982_vm0, %v1979_v36 }
 0x2a7 PF: > { %p16_p10 = scmp.ge.s32.totalorder %s2828_s16, 4   ;;  %s3300_s18 = smov %s2713_s19 }
 0x2a8   : > { %s3301_s19 = smov %s2717_s20  ;;  %s3302_s20 = smov %s2837_s26 }
 0x2a9   : > { %s3303_s21 = smov %s2828_s16  ;;  %18 = sbr.rel (!%p16_p10) target bundleno = 4 (0x4), region = 88 }
 0x2ae   :  { %2021 = vsyncpa [#allocation3], 1 }
 0x2af   :  { %2023 = vsyncpa [#allocation3 + $0x1], 1 }
 0x2b0   :  { %2024 = vsyncpa [#allocation5], 1 }

</bundles_post_ra>
